<compile_context>
chip_gen: v7x
topology: tpu7x:2x2x1
jax: 0.10.0
libtpu: 0.0.40
codegen_flags: <defaults>
</compile_context>

<pallas_src>
import jax
import jax.numpy as jnp
from jax.experimental import pallas as pl
from jax.experimental.pallas import tpu as pltpu

NEG_SLOPE = 0.01      # PyTorch nn.LeakyReLU / F.leaky_relu default negative slope
BN_EPS = 1e-5         # PyTorch BatchNorm1d default eps
FEAT = 1024           # backbone output feature size
DEFAULT_TN = 1024     # points-tile (intermediates ~12 MiB f32/bf16 per tile)
VMEM_LIMIT = 32 * 1024 * 1024   # explicit scoped-VMEM budget (safe on v5e/v6e/v7x)


def _leaky(x):
    # valid for negative_slope in [0, 1): max(x, a*x) == leaky_relu(x)
    return jnp.maximum(x, NEG_SLOPE * x)


def _round_up(n, m):
    return ((n + m - 1) // m) * m


def _pad_points(x, tn_target=DEFAULT_TN):
    """Pad the points axis with replicas of the first point so N is a multiple of the
    tile size. Replicated points produce identical per-point features, so the global
    max over points is unchanged (exact) and no in-kernel masking is needed."""
    B, N, C = x.shape
    TN = tn_target if N >= tn_target else _round_up(N, 8)
    Np = _round_up(N, TN)
    if Np != N:
        pad = jnp.broadcast_to(x[:, :1, :], (B, Np - N, C))
        x = jnp.concatenate([x, pad], axis=1)
    return x, TN


# ----------------------------------------------------------------------------
# Kernel 1: PointNet backbone — 4 x (1x1 conv + folded BN + LeakyReLU), then a
# global max-pool over points. Grid = (batch, N-tiles); running max lives in the
# VMEM-resident output block (constant block index across the N-tile axis).
# ----------------------------------------------------------------------------
def backbone_kernel(x_ref, w1, b1, w2, b2, w3, b3, w4, b4, out_ref):
    n = pl.program_id(1)

    x = x_ref[0]                                                    # (TN, 3) f32
    w1v = w1[...]                                                   # (3, 64) f32

    # Layer 1: K=3 contraction as VPU broadcast-FMAs (avoids a tiny-K MXU matmul).
    # Bias + LeakyReLU + bf16 cast fused so only the bf16 copy feeds the next matmul.
    h = _leaky(x[:, 0:1] * w1v[0:1, :]
               + x[:, 1:2] * w1v[1:2, :]
               + x[:, 2:3] * w1v[2:3, :]
               + b1[...]).astype(jnp.bfloat16)                      # (TN, 64) bf16

    # Layers 2-3: bf16 operands on the MXU, f32 accumulation, fused f32 epilogue -> bf16.
    h = _leaky(jnp.dot(h, w2[...], preferred_element_type=jnp.float32)
               + b2[...]).astype(jnp.bfloat16)                      # (TN, 128) bf16
    h = _leaky(jnp.dot(h, w3[...], preferred_element_type=jnp.float32)
               + b3[...]).astype(jnp.bfloat16)                      # (TN, 512) bf16
    # Layer 4 output stays f32: it feeds the f32 max-pool.
    h = _leaky(jnp.dot(h, w4[...], preferred_element_type=jnp.float32)
               + b4[...])                                           # (TN, 1024) f32

    tile_max = jnp.max(h, axis=0, keepdims=True)                    # (1, 1024) f32

    @pl.when(n == 0)
    def _():
        out_ref[0] = tile_max

    @pl.when(n > 0)
    def _():
        out_ref[0] = jnp.maximum(out_ref[0], tile_max)


def pointnet_backbone(x, conv_params, tile_n=DEFAULT_TN):
    """x: (B, N, 3) f32 -> (B, 1024) f32. Equivalent to NewPointNet(x.permute(0,2,1))."""
    x, TN = _pad_points(x, tile_n)
    B, Np, C = x.shape
    n_tiles = Np // TN

    flat = []
    for w, b in conv_params:
        flat.extend([w, b])

    in_specs = [pl.BlockSpec((1, TN, C), lambda bi, ni: (bi, ni, 0))]
    for a in flat:                              # weights/biases: full 2-D blocks, resident
        in_specs.append(pl.BlockSpec(a.shape, lambda bi, ni: (0, 0)))

    out = pl.pallas_call(
        backbone_kernel,
        out_shape=jax.ShapeDtypeStruct((B, 1, FEAT), jnp.float32),
        grid=(B, n_tiles),
        in_specs=in_specs,
        out_specs=pl.BlockSpec((1, 1, FEAT), lambda bi, ni: (bi, 0, 0)),
        compiler_params=pltpu.CompilerParams(
            dimension_semantics=("parallel", "arbitrary"),
            vmem_limit_bytes=VMEM_LIMIT),
    )(x, *flat)
    return out.reshape(B, FEAT)                 # == x.view(-1, 1024 * 1) in PyTorch


# ----------------------------------------------------------------------------
# Kernel 2: FC head — fc1/fc2 (+dropout=identity)/fc3 with LeakyReLU, then fc4.
# Small weights (bf16, ~5 MiB) + tiny activations live in VMEM; single grid point.
# TODO(synk): at large B, tile B (or fc1's K) to overlap weight DMA with compute;
# at B=2 the head is tiny and weight-bandwidth bound either way.
# ----------------------------------------------------------------------------
def head_kernel(x_ref, w1, b1, w2, b2, w3, b3, w4, b4, out_ref):
    x = x_ref[...].astype(jnp.bfloat16)                             # (B, 2048)
    # Dropout(p=0.2) is identity at inference time.
    h = _leaky(jnp.dot(x, w1[...], preferred_element_type=jnp.float32)
               + b1[...]).astype(jnp.bfloat16)
    h = _leaky(jnp.dot(h, w2[...], preferred_element_type=jnp.float32)
               + b2[...]).astype(jnp.bfloat16)
    h = _leaky(jnp.dot(h, w3[...], preferred_element_type=jnp.float32)
               + b3[...]).astype(jnp.bfloat16)
    # k_out=5 (<128 lanes) -> masked partial store; negligible at this size.
    out_ref[...] = jnp.dot(h, w4[...], preferred_element_type=jnp.float32) + b4[...]


def fc_head(x, fc_params):
    B = x.shape[0]
    k_out = fc_params[-1][0].shape[1]
    flat = []
    for w, b in fc_params:
        flat.extend([w, b])
    return pl.pallas_call(
        head_kernel,
        out_shape=jax.ShapeDtypeStruct((B, k_out), jnp.float32),
        compiler_params=pltpu.CompilerParams(vmem_limit_bytes=VMEM_LIMIT),
    )(x, *flat)


# ----------------------------------------------------------------------------
# Parameter construction (deterministic, synthetic). Eval-mode BN folded into conv
# weights. Weights stored transposed vs PyTorch: (C_in, C_out) so y = x @ W + b.
# Conv layers 2-4 and FC weights are bf16 (MXU operands); layer-1/biases are f32.
# ----------------------------------------------------------------------------
def init_params(key, k_out=5):
    mlp = [64, 128, 512, 1024]
    keys = jax.random.split(key, 32)
    ki = 0

    conv_params = []
    in_d = 3
    for li, out_d in enumerate(mlp):
        kw, kb, kg, kbe, km, kv = keys[ki:ki + 6]; ki += 6
        w = 0.05 * jax.random.normal(kw, (in_d, out_d), jnp.float32)
        b = 0.05 * jax.random.normal(kb, (out_d,), jnp.float32)
        gamma = 1.0 + 0.1 * jax.random.normal(kg, (out_d,), jnp.float32)
        beta = 0.1 * jax.random.normal(kbe, (out_d,), jnp.float32)
        mean = 0.1 * jax.random.normal(km, (out_d,), jnp.float32)
        var = 1.0 + 0.1 * jnp.abs(jax.random.normal(kv, (out_d,), jnp.float32))
        # fold eval-mode BatchNorm1d into the 1x1 conv (exact)
        scale = gamma / jnp.sqrt(var + BN_EPS)
        w_f = w * scale[None, :]
        b_f = (b - mean) * scale + beta
        if li > 0:                               # MXU layers use bf16 operands
            w_f = w_f.astype(jnp.bfloat16)
        conv_params.append((w_f, b_f.reshape(1, out_d).astype(jnp.float32)))
        in_d = out_d

    fc_dims = [(2 * FEAT, 1024), (1024, 512), (512, 64), (64, k_out)]
    fc_params = []
    for din, dout in fc_dims:
        kw, kb = keys[ki:ki + 2]; ki += 2
        w = (jax.random.normal(kw, (din, dout), jnp.float32)
             / jnp.sqrt(float(din))).astype(jnp.bfloat16)
        b = 0.05 * jax.random.normal(kb, (dout,), jnp.float32)
        fc_params.append((w, b.reshape(1, dout)))

    return conv_params, fc_params


def new_model_forward(x1, x2, conv_params, fc_params):
    """x1, x2: (B, N, 3) — matches NewModel.forward (which permutes to (B,3,N) internally)."""
    B = x1.shape[0]
    x = jnp.concatenate([x1, x2], axis=0)            # (2B, N, 3): one backbone call
    feats = pointnet_backbone(x, conv_params)        # (2B, 1024)
    feat = jnp.concatenate([feats[:B], feats[B:]], axis=1)   # (B, 2048)
    return fc_head(feat, fc_params)                  # (B, k)


if __name__ == "__main__":
    key = jax.random.PRNGKey(0)
    kp, k1, k2 = jax.random.split(key, 3)
    conv_params, fc_params = init_params(kp, k_out=5)

    B, N = 2, 16
    x1 = jax.random.normal(k1, (B, N, 3), jnp.float32)
    x2 = jax.random.normal(k2, (B, N, 3), jnp.float32)

    out = new_model_forward(x1, x2, conv_params, fc_params)
    out = jax.block_until_ready(out)
    assert out.shape == (B, 5), out.shape
    print("KERNEL_OK")
</pallas_src>

<mosaic_0001>
module attributes {stable_mosaic.version = 11 : i64} {
  func.func @backbone_kernel(%arg0: i32, %arg1: i32, %arg2: memref<1x16x3xf32, #tpu.memory_space<vmem>>, %arg3: memref<3x64xf32, #tpu.memory_space<vmem>>, %arg4: memref<1x64xf32, #tpu.memory_space<vmem>>, %arg5: memref<64x128xbf16, #tpu.memory_space<vmem>>, %arg6: memref<1x128xf32, #tpu.memory_space<vmem>>, %arg7: memref<128x512xbf16, #tpu.memory_space<vmem>>, %arg8: memref<1x512xf32, #tpu.memory_space<vmem>>, %arg9: memref<512x1024xbf16, #tpu.memory_space<vmem>>, %arg10: memref<1x1024xf32, #tpu.memory_space<vmem>>, %arg11: memref<1x1x1024xf32, #tpu.memory_space<vmem>>) attributes {dimension_semantics = [#tpu.dimension_semantics<parallel>, #tpu.dimension_semantics<arbitrary>], iteration_bounds = array<i64: 4, 1>, scalar_prefetch = 0 : i64, scratch_operands = 0 : i64, tpu.core_type = #tpu.core_type<tc>, window_params = [{transform_indices = @transform_0, window_bounds = array<i64: 1, 16, 3>}, {pipeline_mode = #tpu.pipeline_mode<synchronous>, transform_indices = @transform_1, window_bounds = array<i64: 3, 64>}, {pipeline_mode = #tpu.pipeline_mode<synchronous>, transform_indices = @transform_2, window_bounds = array<i64: 1, 64>}, {pipeline_mode = #tpu.pipeline_mode<synchronous>, transform_indices = @transform_3, window_bounds = array<i64: 64, 128>}, {pipeline_mode = #tpu.pipeline_mode<synchronous>, transform_indices = @transform_4, window_bounds = array<i64: 1, 128>}, {pipeline_mode = #tpu.pipeline_mode<synchronous>, transform_indices = @transform_5, window_bounds = array<i64: 128, 512>}, {pipeline_mode = #tpu.pipeline_mode<synchronous>, transform_indices = @transform_6, window_bounds = array<i64: 1, 512>}, {pipeline_mode = #tpu.pipeline_mode<synchronous>, transform_indices = @transform_7, window_bounds = array<i64: 512, 1024>}, {pipeline_mode = #tpu.pipeline_mode<synchronous>, transform_indices = @transform_8, window_bounds = array<i64: 1, 1024>}, {transform_indices = @transform_9, window_bounds = array<i64: 1, 1, 1024>}]} {
    %c0 = arith.constant 0 : index
    %c0_0 = arith.constant 0 : index
    %c0_1 = arith.constant 0 : index
    %0 = vector.load %arg2[%c0, %c0_0, %c0_1] : memref<1x16x3xf32, #tpu.memory_space<vmem>>, vector<1x16x3xf32>
    %1 = vector.shape_cast %0 : vector<1x16x3xf32> to vector<16x3xf32>
    %c0_2 = arith.constant 0 : index
    %c0_3 = arith.constant 0 : index
    %2 = vector.load %arg3[%c0_2, %c0_3] : memref<3x64xf32, #tpu.memory_space<vmem>>, vector<3x64xf32>
    %3 = vector.extract_strided_slice %1 {offsets = [0, 0], sizes = [16, 1], strides = [1, 1]} : vector<16x3xf32> to vector<16x1xf32>
    %4 = vector.extract_strided_slice %2 {offsets = [0, 0], sizes = [1, 64], strides = [1, 1]} : vector<3x64xf32> to vector<1x64xf32>
    %5 = vector.broadcast %3 : vector<16x1xf32> to vector<16x64xf32>
    %6 = vector.broadcast %4 : vector<1x64xf32> to vector<16x64xf32>
    %7 = arith.mulf %5, %6 : vector<16x64xf32>
    %8 = vector.extract_strided_slice %1 {offsets = [0, 1], sizes = [16, 1], strides = [1, 1]} : vector<16x3xf32> to vector<16x1xf32>
    %9 = vector.extract_strided_slice %2 {offsets = [1, 0], sizes = [1, 64], strides = [1, 1]} : vector<3x64xf32> to vector<1x64xf32>
    %10 = vector.broadcast %8 : vector<16x1xf32> to vector<16x64xf32>
    %11 = vector.broadcast %9 : vector<1x64xf32> to vector<16x64xf32>
    %12 = arith.mulf %10, %11 : vector<16x64xf32>
    %13 = arith.addf %7, %12 : vector<16x64xf32>
    %14 = vector.extract_strided_slice %1 {offsets = [0, 2], sizes = [16, 1], strides = [1, 1]} : vector<16x3xf32> to vector<16x1xf32>
    %15 = vector.extract_strided_slice %2 {offsets = [2, 0], sizes = [1, 64], strides = [1, 1]} : vector<3x64xf32> to vector<1x64xf32>
    %16 = vector.broadcast %14 : vector<16x1xf32> to vector<16x64xf32>
    %17 = vector.broadcast %15 : vector<1x64xf32> to vector<16x64xf32>
    %18 = arith.mulf %16, %17 : vector<16x64xf32>
    %19 = arith.addf %13, %18 : vector<16x64xf32>
    %c0_4 = arith.constant 0 : index
    %c0_5 = arith.constant 0 : index
    %20 = vector.load %arg4[%c0_4, %c0_5] : memref<1x64xf32, #tpu.memory_space<vmem>>, vector<1x64xf32>
    %21 = vector.broadcast %20 : vector<1x64xf32> to vector<16x64xf32>
    %22 = arith.addf %19, %21 : vector<16x64xf32>
    %cst = arith.constant 0.00999999977 : f32
    %23 = vector.broadcast %cst : f32 to vector<16x64xf32>
    %24 = arith.mulf %23, %22 : vector<16x64xf32>
    %25 = arith.maximumf %22, %24 : vector<16x64xf32>
    %26 = arith.truncf %25 : vector<16x64xf32> to vector<16x64xbf16>
    %c0_6 = arith.constant 0 : index
    %c0_7 = arith.constant 0 : index
    %27 = vector.load %arg5[%c0_6, %c0_7] : memref<64x128xbf16, #tpu.memory_space<vmem>>, vector<64x128xbf16>
    %cst_8 = arith.constant dense<0.000000e+00> : vector<16x128xf32>
    %28 = tpu.matmul %26, %27, %cst_8 {dimension_numbers = #tpu.dot_dimension_numbers<[1], [0], [0], [1], [0, 0, 1, 1], [], []>} : vector<16x64xbf16>, vector<64x128xbf16>, vector<16x128xf32> -> vector<16x128xf32>
    %c0_9 = arith.constant 0 : index
    %c0_10 = arith.constant 0 : index
    %29 = vector.load %arg6[%c0_9, %c0_10] : memref<1x128xf32, #tpu.memory_space<vmem>>, vector<1x128xf32>
    %30 = vector.broadcast %29 : vector<1x128xf32> to vector<16x128xf32>
    %31 = arith.addf %28, %30 : vector<16x128xf32>
    %cst_11 = arith.constant 0.00999999977 : f32
    %32 = vector.broadcast %cst_11 : f32 to vector<16x128xf32>
    %33 = arith.mulf %32, %31 : vector<16x128xf32>
    %34 = arith.maximumf %31, %33 : vector<16x128xf32>
    %35 = arith.truncf %34 : vector<16x128xf32> to vector<16x128xbf16>
    %c0_12 = arith.constant 0 : index
    %c0_13 = arith.constant 0 : index
    %36 = vector.load %arg7[%c0_12, %c0_13] : memref<128x512xbf16, #tpu.memory_space<vmem>>, vector<128x512xbf16>
    %cst_14 = arith.constant dense<0.000000e+00> : vector<16x512xf32>
    %37 = tpu.matmul %35, %36, %cst_14 {dimension_numbers = #tpu.dot_dimension_numbers<[1], [0], [0], [1], [0, 0, 1, 1], [], []>} : vector<16x128xbf16>, vector<128x512xbf16>, vector<16x512xf32> -> vector<16x512xf32>
    %c0_15 = arith.constant 0 : index
    %c0_16 = arith.constant 0 : index
    %38 = vector.load %arg8[%c0_15, %c0_16] : memref<1x512xf32, #tpu.memory_space<vmem>>, vector<1x512xf32>
    %39 = vector.broadcast %38 : vector<1x512xf32> to vector<16x512xf32>
    %40 = arith.addf %37, %39 : vector<16x512xf32>
    %cst_17 = arith.constant 0.00999999977 : f32
    %41 = vector.broadcast %cst_17 : f32 to vector<16x512xf32>
    %42 = arith.mulf %41, %40 : vector<16x512xf32>
    %43 = arith.maximumf %40, %42 : vector<16x512xf32>
    %44 = arith.truncf %43 : vector<16x512xf32> to vector<16x512xbf16>
    %c0_18 = arith.constant 0 : index
    %c0_19 = arith.constant 0 : index
    %45 = vector.load %arg9[%c0_18, %c0_19] : memref<512x1024xbf16, #tpu.memory_space<vmem>>, vector<512x1024xbf16>
    %cst_20 = arith.constant dense<0.000000e+00> : vector<16x1024xf32>
    %46 = tpu.matmul %44, %45, %cst_20 {dimension_numbers = #tpu.dot_dimension_numbers<[1], [0], [0], [1], [0, 0, 1, 1], [], []>} : vector<16x512xbf16>, vector<512x1024xbf16>, vector<16x1024xf32> -> vector<16x1024xf32>
    %c0_21 = arith.constant 0 : index
    %c0_22 = arith.constant 0 : index
    %47 = vector.load %arg10[%c0_21, %c0_22] : memref<1x1024xf32, #tpu.memory_space<vmem>>, vector<1x1024xf32>
    %48 = vector.broadcast %47 : vector<1x1024xf32> to vector<16x1024xf32>
    %49 = arith.addf %46, %48 : vector<16x1024xf32>
    %cst_23 = arith.constant 0.00999999977 : f32
    %50 = vector.broadcast %cst_23 : f32 to vector<16x1024xf32>
    %51 = arith.mulf %50, %49 : vector<16x1024xf32>
    %52 = arith.maximumf %49, %51 : vector<16x1024xf32>
    %cst_24 = arith.constant dense<0xFF800000> : vector<1024xf32>
    %53 = vector.multi_reduction <maximumf>, %52, %cst_24 [0] : vector<16x1024xf32> to vector<1024xf32>
    %54 = vector.shape_cast %53 : vector<1024xf32> to vector<1x1024xf32>
    %c0_i32 = arith.constant 0 : i32
    %55 = arith.cmpi eq, %arg1, %c0_i32 : i32
    %56 = arith.extui %55 : i1 to i32
    %c0_i32_25 = arith.constant 0 : i32
    %57 = arith.cmpi ne, %56, %c0_i32_25 : i32
    scf.if %57 {
      %c0_28 = arith.constant 0 : index
      %c0_29 = arith.constant 0 : index
      %c0_30 = arith.constant 0 : index
      %61 = vector.load %arg11[%c0_28, %c0_29, %c0_30] : memref<1x1x1024xf32, #tpu.memory_space<vmem>>, vector<1x1x1024xf32>
      %62 = vector.shape_cast %61 : vector<1x1x1024xf32> to vector<1x1024xf32>
      %63 = vector.shape_cast %54 : vector<1x1024xf32> to vector<1x1x1024xf32>
      tpu.vector_store %arg11[%c0_28, %c0_29, %c0_30], %63 {strides = array<i32>} : memref<1x1x1024xf32, #tpu.memory_space<vmem>>, vector<1x1x1024xf32>,
    } else {
    }
    %c0_i32_26 = arith.constant 0 : i32
    %58 = arith.cmpi sgt, %arg1, %c0_i32_26 : i32
    %59 = arith.extui %58 : i1 to i32
    %c0_i32_27 = arith.constant 0 : i32
    %60 = arith.cmpi ne, %59, %c0_i32_27 : i32
    scf.if %60 {
      %c0_28 = arith.constant 0 : index
      %c0_29 = arith.constant 0 : index
      %c0_30 = arith.constant 0 : index
      %61 = vector.load %arg11[%c0_28, %c0_29, %c0_30] : memref<1x1x1024xf32, #tpu.memory_space<vmem>>, vector<1x1x1024xf32>
      %62 = vector.shape_cast %61 : vector<1x1x1024xf32> to vector<1x1024xf32>
      %63 = arith.maximumf %62, %54 : vector<1x1024xf32>
      %c0_31 = arith.constant 0 : index
      %c0_32 = arith.constant 0 : index
      %c0_33 = arith.constant 0 : index
      %64 = vector.load %arg11[%c0_31, %c0_32, %c0_33] : memref<1x1x1024xf32, #tpu.memory_space<vmem>>, vector<1x1x1024xf32>
      %65 = vector.shape_cast %64 : vector<1x1x1024xf32> to vector<1x1024xf32>
      %66 = vector.shape_cast %63 : vector<1x1024xf32> to vector<1x1x1024xf32>
      tpu.vector_store %arg11[%c0_31, %c0_32, %c0_33], %66 {strides = array<i32>} : memref<1x1x1024xf32, #tpu.memory_space<vmem>>, vector<1x1x1024xf32>,
    } else {
    }
    return
  }
  func.func @transform_0(%arg0: i32, %arg1: i32) -> (i32, i32, i32) {
    %c0_i32 = arith.constant 0 : i32
    %c0_i32_0 = arith.constant 0 : i32
    return %arg0, %arg1, %c0_i32 : i32, i32, i32
  }
  func.func @transform_1(%arg0: i32, %arg1: i32) -> (i32, i32) {
    %c0_i32 = arith.constant 0 : i32
    %c0_i32_0 = arith.constant 0 : i32
    %c0_i32_1 = arith.constant 0 : i32
    return %c0_i32, %c0_i32_0 : i32, i32
  }
  func.func @transform_2(%arg0: i32, %arg1: i32) -> (i32, i32) {
    %c0_i32 = arith.constant 0 : i32
    %c0_i32_0 = arith.constant 0 : i32
    %c0_i32_1 = arith.constant 0 : i32
    return %c0_i32, %c0_i32_0 : i32, i32
  }
  func.func @transform_3(%arg0: i32, %arg1: i32) -> (i32, i32) {
    %c0_i32 = arith.constant 0 : i32
    %c0_i32_0 = arith.constant 0 : i32
    %c0_i32_1 = arith.constant 0 : i32
    return %c0_i32, %c0_i32_0 : i32, i32
  }
  func.func @transform_4(%arg0: i32, %arg1: i32) -> (i32, i32) {
    %c0_i32 = arith.constant 0 : i32
    %c0_i32_0 = arith.constant 0 : i32
    %c0_i32_1 = arith.constant 0 : i32
    return %c0_i32, %c0_i32_0 : i32, i32
  }
  func.func @transform_5(%arg0: i32, %arg1: i32) -> (i32, i32) {
    %c0_i32 = arith.constant 0 : i32
    %c0_i32_0 = arith.constant 0 : i32
    %c0_i32_1 = arith.constant 0 : i32
    return %c0_i32, %c0_i32_0 : i32, i32
  }
  func.func @transform_6(%arg0: i32, %arg1: i32) -> (i32, i32) {
    %c0_i32 = arith.constant 0 : i32
    %c0_i32_0 = arith.constant 0 : i32
    %c0_i32_1 = arith.constant 0 : i32
    return %c0_i32, %c0_i32_0 : i32, i32
  }
  func.func @transform_7(%arg0: i32, %arg1: i32) -> (i32, i32) {
    %c0_i32 = arith.constant 0 : i32
    %c0_i32_0 = arith.constant 0 : i32
    %c0_i32_1 = arith.constant 0 : i32
    return %c0_i32, %c0_i32_0 : i32, i32
  }
  func.func @transform_8(%arg0: i32, %arg1: i32) -> (i32, i32) {
    %c0_i32 = arith.constant 0 : i32
    %c0_i32_0 = arith.constant 0 : i32
    %c0_i32_1 = arith.constant 0 : i32
    return %c0_i32, %c0_i32_0 : i32, i32
  }
  func.func @transform_9(%arg0: i32, %arg1: i32) -> (i32, i32, i32) {
    %c0_i32 = arith.constant 0 : i32
    %c0_i32_0 = arith.constant 0 : i32
    %c0_i32_1 = arith.constant 0 : i32
    return %arg0, %c0_i32, %c0_i32_0 : i32, i32, i32
  }
}

</mosaic_0001>

<bundles_post_ra>
// kernel: tpu_custom_call.1
= control target key start
LH: loop header
LB: loop body
LE: loop exit
PB: predicated region body
PF: predicated region fallthrough
CT: control target
= control target key end

     0   :  { %14 = vsyncpa [#allocation3], 0  ;;  %s4138_s0 = inlined_call_operand.vmem [shape: f32[4,16,3], index: 0, kind: input, shape index: {}]   ;;  %s4139_s1 = inlined_call_operand.vmem [shape: f32[3,64], index: 1, kind: input, shape index: {}]   ;;  %s4140_s2 = inlined_call_operand.vmem [shape: f32[1,64], index: 2, kind: input, shape index: {}]   ;;  %s4141_s3 = inlined_call_operand.vmem [shape: bf16[64,128], index: 3, kind: input, shape index: {}]   ;;  %s4142_s4 = inlined_call_operand.vmem [shape: f32[1,128], index: 4, kind: input, shape index: {}]   ;;  %s4143_s5 = inlined_call_operand.hbm [shape: bf16[128,512], index: 5, kind: input, shape index: {}]   ;;  %s4144_s6 = inlined_call_operand.vmem [shape: f32[1,512], index: 6, kind: input, shape index: {}]   ;;  %s4145_s7 = inlined_call_operand.hbm [shape: bf16[512,1024], index: 7, kind: input, shape index: {}]   ;;  %s4146_s8 = inlined_call_operand.vmem [shape: f32[1,1024], index: 8, kind: input, shape index: {}]   ;;  %s4147_s9 = inlined_call_operand.hbm [shape: f32[4,1,1024], index: 9, kind: output, shape index: {}]  }
   0x1   :  { %15 = vsyncpa [#allocation6], 0 }
   0x2   :  { %16 = vsyncpa [#allocation4], 0 }
   0x3   :  { %18 = vsyncpa [#allocation4 + $0x1], 0  ;;  %s3824_s30 = smov 0   ;;  %s3826_s10 = smov 0  }
   0x4   :  { %s3828_s11 = smov 0   ;;  %s3830_s12 = smov 0  }
   0x5   :  { %s3832_s13 = smov 0   ;;  %s3834_s14 = smov 0  }
   0x6 LB: > { %4156 = sst [smem:[#allocation11_spill]] %s3747_s11  ;;  %s3112_s15 = sadd.s32 4294967295, %s3759_s14   ;;  %s3759_s14 = sphi %s3834_s14, %s24_s14   ;;  %s3755_s13 = sphi %s3832_s13, %s4174_s13   ;;  %s3751_s12 = sphi %s3830_s12, %s4173_s12   ;;  %s3747_s11 = sphi %s3828_s11, %s4172_s11   ;;  %s3743_s10 = sphi %s3826_s10, %s4176_s10   ;;  %s3739_s30 = sphi %s3824_s30, %s4175_s30  }
   0x7   : > { %4157 = sst [smem:[#allocation12_spill]] %s3755_s13  ;;  %s3113_s16 = sadd.s32 4294967294, %s3759_s14  }
   0x8   : > { %s36_s17 = sadd.s32 1, %s3755_s13  ;;  %s239_s18 = sadd.s32 1, %s3747_s11 }
   0x9   : > { %p38_p0 = scmp.ge.s32.totalorder %s36_s17, 4  ;;  %p249_p1 = scmp.ne.s32.totalorder %s3747_s11, %s3743_s10 }
   0xa   : > { %p250_p2 = scmp.eq.s32.totalorder %s3112_s15, 3  ;;  %p255_p3 = scmp.ne.s32.totalorder %s3743_s10, %s3739_s30 }
   0xb   : > { %s4178_s17 = smov (%p38_p0, %s36_s17), 0  ;;  %p256_p5 = scmp.eq.s32.totalorder %s3113_s16, 3 }
   0xc   : > { %4158 = sst [smem:[#allocation13_spill]] %s4178_s17  ;;  %p3864_p4 = por %p250_p2, %p249_p1 }
   0xd   : > { %s236_s20 = ssub.s32 %s3755_s13, %s4178_s17  ;;  %p3114_p6 = scmp.ge.s32.totalorder %s3759_s14, 1 }
   0xe   : > { %s4159_s19 = scalar_select %p3864_p4, 1, 0 }
   0xf   : > { %p237_p7 = scmp.eq.s32.totalorder %s236_s20, 0  ;;  %p3871_p8 = por %p256_p5, %p255_p3 }
  0x10   : > { %p263_p9 = scmp.lt.s32.totalorder %s3759_s14, 5  ;;  %p3883_p11 = scmp.eq.s32.totalorder %s3112_s15, 0 }
  0x11   : > { %s4160_s21 = scalar_select %p3871_p8, 1, 0 }
  0x12   : > { %s3877_s22 = scalar_select %p237_p7, %s3747_s11, %s239_s18  }
  0x13   : > { %4161 = sst [smem:[#allocation14_spill]] %s4160_s21  ;;  %p3879_p10 = pnand %p3114_p6, %p263_p9 }
  0x14   : > { %4162 = sst [smem:[#allocation15_spill]] %s3877_s22  ;;  %s3761_s25 = smov [#allocation2]  }
  0x15   : > { %s4163_s23 = scalar_select %p3879_p10, 1, 0 }
  0x16   : > { %s4164_s24 = scalar_select %p3883_p11, 1, 0 }
  0x17   : > { %p3485_p12 = pneg %p3879_p10  ;;  %s287_s26 = sshll.u32 %s3761_s25, 4  ;;  %s288_s26 = int_to_ptr.vmem [resolvable:$true] %s287_s26 }
  0x18   : > { %s3762_s28 = smov [#allocation5]   ;;  %s3617_s18 = scalar_lea.hbm %s4143_s5, 4096 }
  0x19   : > { %p3891_p13 = pnand %p3883_p11, %p3485_p12  ;;  %s303_s29 = sshll.u32 %s3762_s28, 4  ;;  %s3895_s29 = int_to_ptr.vmem [resolvable:$true] %s303_s29 }
  0x1a   : > { %p3618_p0 = scmp.ne.s32.totalorder %s4143_s5, %s3617_s18  ;;  %p3624_p5 = scmp.lt.u32.totalorder %s3617_s18, %s4143_s5 }
  0x1b   : > { %p3619_p1 = pneg %p3891_p13 }
  0x1d   : > { %p3620_p2 = pnand %p3619_p1, %p3618_p0 }
  0x1f   : > { %p3621_p3 = pneg %p3620_p2 }
  0x21   : > { %p3626_p6 = pnand %p3624_p5, %p3621_p3 }
  0x23   : > { %3629 = shalt.err (!%p3626_p6)
}
  0x24   : > { %s3630_s28 = scalar_lea.vmem %s288_s26, 4096  ;;  %p3638_p8 = scmp.lt.s32.totalorder %s288_s26, %s288_s26 }
  0x25   : > { %p3631_p7 = scmp.ne.s32.totalorder %s288_s26, %s3630_s28  ;;  %p3639_p4 = scmp.lt.s32.totalorder %s3630_s28, %s3630_s28 }
  0x27   : > { %p3633_p9 = pnand %p3631_p7, %p3619_p1  ;;  %p3640_p11 = por %p3639_p4, %p3638_p8 }
  0x29   : > { %p3634_p12 = pneg %p3633_p9 }
  0x2b   : > { %p3641_p10 = pnand %p3640_p11, %p3634_p12 }
  0x2d   : > { %3644 = shalt.err (!%p3641_p10)
}
  0x2e   : > { %s3763_s17 = smov 256   ;;  %s3764_s15 = smov 16  }
  0x2f   : > { %3488 = dma.hbm_to_vmem [thread:$0]  (!%p3891_p13), %s4143_s5, 4096, %s288_s26, [#allocation3], %s3763_s17, %s3763_s17, %s3764_s15  }
  0x30   : > { %s3645_s25 = scalar_lea.hbm %s4145_s7, 32768 }
  0x31   : > { %p3646_p0 = scmp.ne.s32.totalorder %s4145_s7, %s3645_s25  ;;  %p3652_p10 = scmp.lt.u32.totalorder %s3645_s25, %s4145_s7 }
  0x33   : > { %p3648_p4 = pnand %p3646_p0, %p3619_p1 }
  0x35   : > { %p3649_p8 = pneg %p3648_p4 }
  0x37   : > { %p3654_p11 = pnand %p3652_p10, %p3649_p8 }
  0x39   : > { %3657 = shalt.err (!%p3654_p11)
}
  0x3a   : > { %s3658_s26 = scalar_lea.vmem %s3895_s29, 32768  ;;  %p3666_p6 = scmp.lt.s32.totalorder %s3895_s29, %s3895_s29 }
  0x3b   : > { %p3659_p2 = scmp.ne.s32.totalorder %s3895_s29, %s3658_s26  ;;  %p3667_p7 = scmp.lt.s32.totalorder %s3658_s26, %s3658_s26 }
  0x3d   : > { %p3661_p3 = pnand %p3659_p2, %p3619_p1  ;;  %p3668_p9 = por %p3667_p7, %p3666_p6 }
  0x3f   : > { %p3662_p5 = pneg %p3661_p3 }
  0x41   : > { %p3669_p12 = pnand %p3668_p9, %p3662_p5 }
  0x43   : > { %3672 = shalt.err (!%p3669_p12)
}
  0x44   : > { %s3765_s11 = smov 512   ;;  %s3766_s21 = smov 32  }
  0x45   : > { %3491 = dma.hbm_to_vmem [thread:$0]  (!%p3891_p13), %s4145_s7, 32768, %s3895_s29, [#allocation6], %s3765_s11, %s3765_s11, %s3766_s21  }
  0x46   : > { %p4166_p0 = scmp.ne.s32.totalorder %s4163_s23, 0 }
  0x47   : > { %p4167_p1 = scmp.ne.s32.totalorder (!%p4166_p0), %s4164_s24, 0 }
  0x48   : > { %335 = sbr.rel (%p4166_p0) target bundleno = 1136 (0x470), region = 56 }
  0x4f   : > { %3726 = dma.done.wait (%p4167_p1), [#allocation3], 4096  }
  0x50   : > { %3728 = vsyncadd (%p4167_p1), [#allocation3], 4294963200 }
  0x51   : > { %3730 = dma.done.wait (%p4167_p1), [#allocation6], 32768  }
  0x52   : > { %3732 = vsyncadd (%p4167_p1), [#allocation6], 4294934528  ;;  %p380_p4 = scmp.lt.s32.totalorder %s3751_s12, 3  ;;  %v3767_v0 = vmov 1   ;;  %v3768_v1 = vmov 0   ;;  %v3565_v4 = vld [vmem:[%s4141_s3] sm:$0xff]   ;;  %v403_v22 = vlaneseq }
  0x53   : > { %3562 = vset.pattern.permute.xlu1 %v3767_v0  ;;  %3561 = vset.pattern.permute.xlu0 %v3768_v1  ;;  %v3769_v5 = vmov 0.0   ;;  %v3770_v6 = vmov 2   ;;  %v3566_v7 = vld [vmem:[%s4141_s3 + $0x8] sm:$0xff]   ;;  %v3567_v8 = vld [vmem:[%s4141_s3 + $0x10] sm:$0xff]   ;;  %v3568_v9 = vld [vmem:[%s4141_s3 + $0x18] sm:$0xff]   ;;  %vm3771_vm0 = vmmov 0  }
  0x54   : > { %s381_s23 = scalar_select %p380_p4, %s3751_s12, 3  ;;  %790 = vmatprep.mubr.bf16.mxu1 %v3768_v1  ;;  %3431 = vmatprep.subr.bf16.mxu0 %v3769_v5  ;;  %v3569_v10 = vld [vmem:[#allocation2 + $0x4] ss:$16 sps:$4 sm:$0xff]   ;;  %v3573_v11 = vld [vmem:[#allocation2 + $0xc] ss:$16 sps:$4 sm:$0xff]   ;;  %v3973_v23 = vshrl.u32 %v403_v22, 7 }
  0x55   : > { %3432 = vmatpush3.bf16.msra.mxu0 %v3565_v4  ;;  %3439 = vmatprep.mubr.msk.bf16.mxu0 %vm3771_vm0, %v3769_v5  ;;  %v3574_v12 = vld [vmem:[#allocation2] ss:$16 sps:$4 sm:$0xff]   ;;  %v3575_v13 = vld [vmem:[#allocation2 + $0x24] ss:$16 sps:$4 sm:$0xff]   ;;  %vm494_vm1 = vcmask 523264   ;;  %s376_s18 = sand.u32 1, %s3743_s10  }
  0x56   : > { %s3424_s27 = sshll.u32 %s381_s23, 4  ;;  %3433 = vmatprep.subr.bf16.mxu0 %v3769_v5  ;;  %758 = vmatprep.subr.bf16.mxu1 %v3569_v10  ;;  %v3580_v14 = vld [vmem:[#allocation2 + $0x20] ss:$16 sps:$4 sm:$0xff]   ;;  %v3581_v15 = vld [vmem:[#allocation2 + $0x44] ss:$16 sps:$4 sm:$0xff]   ;;  %v3976_v24 = vsub.s32 1, %v3973_v23 }
  0x57   : > { %s387_s13 = scalar_lea.vmem %s4138_s0, %s3424_s27  ;;  %759 = vmatpush1.bf16.msra.mxu1 %v3574_v12  ;;  %v3586_v16 = vld [vmem:[#allocation2 + $0x40] ss:$16 sps:$4 sm:$0xff]   ;;  %v3587_v17 = vld [vmem:[#allocation2 + $0x64] ss:$16 sps:$4 sm:$0xff]   ;;  %v3979_v25 = vsub.s32 0, %v3973_v23  ;;  %v3985_v29 = vsub.s32 2, %v3973_v23 }
  0x58   : > { %v390_v2 = vld [vmem:[%s387_s13] sm:$0xff]  ;;  %v391_v3 = vld [vmem:[%s387_s13 + $0x8] sm:$0xff]  ;;  %760 = vmatprep.subr.bf16.mxu1 %v3575_v13  ;;  %s3121_s20 = sshll.u32 %s376_s18, 3  ;;  %s3425_s25 = sshll.u32 %s3751_s12, 7 }
  0x59   : > { %410 = vperm.xlu1 %3562, %v390_v2   ;;  %395 = vperm.xlu0 %3561, %v390_v2   ;;  %v3592_v18 = vld [vmem:[#allocation2 + $0x60] ss:$16 sps:$4 sm:$0xff]   ;;  %v3593_v19 = vld [vmem:[#allocation2 + $0x84] ss:$16 sps:$4 sm:$0xff]   ;;  %v3571_v54 = vld [vmem:[#allocation2 + $0x8] ss:$16 sps:$4 sm:$0xff]   ;;  %s4091_s22 = scalar_lea.hbm %s4147_s9, %s3425_s25 }
  0x5a   : > { %3434 = vmatpush3.bf16.msra.mxu0 %v3566_v7  ;;  %v3598_v20 = vld [vmem:[#allocation2 + $0x80] ss:$16 sps:$4 sm:$0xff]   ;;  %v3599_v21 = vld [vmem:[#allocation2 + $0xa4] ss:$16 sps:$4 sm:$0xff]   ;;  %v3579_v56 = vld [vmem:[#allocation2 + $0x2c] ss:$16 sps:$4 sm:$0xff]  }
  0x5b   : > { %3435 = vmatprep.subr.bf16.mxu0 %v3769_v5  ;;  %761 = vmatpush1.bf16.msra.mxu1 %v3580_v14  ;;  %v392_v26 = vld [vmem:[%s4139_s1] sm:$0x7]  ;;  %v3577_v57 = vld [vmem:[#allocation2 + $0x28] ss:$16 sps:$4 sm:$0xff]   ;;  %v3585_v58 = vld [vmem:[#allocation2 + $0x4c] ss:$16 sps:$4 sm:$0xff]  }
  0x5c   : > { %762 = vmatprep.subr.bf16.mxu1 %v3581_v15  ;;  %v420_v30 = vrot.slane %v392_v26, %v3976_v24  ;;  %v406_v31 = vrot.slane %v392_v26, %v3979_v25  ;;  %v436_v34 = vrot.slane %v392_v26, %v3985_v29  ;;  %v3124_v45 = vld [vmem:[%s4140_s2] ss:$0 sm:$0xff]  ;;  %v3583_v59 = vld [vmem:[#allocation2 + $0x48] ss:$16 sps:$4 sm:$0xff]   ;;  %v3591_v60 = vld [vmem:[#allocation2 + $0x6c] ss:$16 sps:$4 sm:$0xff]  }
  0x5d   : > { %414 = vperm.xlu1 %3562, %v391_v3   ;;  %400 = vperm.xlu0 %3561, %v391_v3   ;;  %v3589_v61 = vld [vmem:[#allocation2 + $0x68] ss:$16 sps:$4 sm:$0xff]   ;;  %v3597_v62 = vld [vmem:[#allocation2 + $0x8c] ss:$16 sps:$4 sm:$0xff]   ;;  %v3611_v7 = vld [vmem:[#allocation2 + $0xe4] ss:$16 sps:$4 sm:$0xff]  }
  0x5e   : > { %3436 = vmatpush3.bf16.msra.mxu0 %v3567_v8  ;;  %v3595_v63 = vld [vmem:[#allocation2 + $0x88] ss:$16 sps:$4 sm:$0xff]   ;;  %v3603_v0 = vld [vmem:[#allocation2 + $0xac] ss:$16 sps:$4 sm:$0xff]   ;;  %v3616_v10 = vld [vmem:[#allocation2 + $0xe0] ss:$16 sps:$4 sm:$0xff]  }
  0x5f   : > { %3437 = vmatprep.subr.bf16.mxu0 %v3769_v5  ;;  %763 = vmatpush1.bf16.msra.mxu1 %v3586_v16  ;;  %v3609_v4 = vld [vmem:[#allocation2 + $0xcc] ss:$16 sps:$4 sm:$0xff]   ;;  %v3607_v5 = vld [vmem:[#allocation2 + $0xc8] ss:$16 sps:$4 sm:$0xff]   ;;  %v868_v12 = vld [vmem:[#allocation5 + $0x20] sm:$0xff]  ;;  %s378_s28 = scalar_lea.vmem [#allocation7], %s3121_s20 }
  0x60   : > { %764 = vmatprep.subr.bf16.mxu1 %v3587_v17  ;;  %v3615_v8 = vld [vmem:[#allocation2 + $0xec] ss:$16 sps:$4 sm:$0xff]   ;;  %s3017_s26 = sshll.u32 %s378_s28, 4  ;;  %s3003_s12 = scalar_lea.sflag [#allocation4], %s376_s18  ;;  %s4093_s26 = int_to_ptr.vmem [resolvable:$true] %s3017_s26 }
  0x61   : > { %3564 = vset.pattern.permute.xlu1 %v3770_v6  ;;  %3563 = vset.pattern.permute.xlu0 %v3770_v6  ;;  %v3610_v6 = vld [vmem:[#allocation2 + $0xc0] ss:$16 sps:$4 sm:$0xff]   ;;  %v865_v13 = vld [vmem:[#allocation5 + $0x8] sm:$0xff]  ;;  %s3673_s17 = scalar_lea.vmem %s4093_s26, 128  ;;  %p4168_p8 = scmp.ne.s32.totalorder %s4159_s19, 0 }
  0x62   : > { %430 = vperm.xlu1 %3564, %v391_v3   ;;  %426 = vperm.xlu0 %3563, %v390_v2   ;;  %v3601_v2 = vld [vmem:[#allocation2 + $0xa8] ss:$16 sps:$4 sm:$0xff]   ;;  %v3604_v3 = vld [vmem:[#allocation2 + $0xa0] ss:$16 sps:$4 sm:$0xff]   ;;  %p3674_p13 = scmp.ne.s32.totalorder %s4093_s26, %s3673_s17  ;;  %s3773_s23 = smov [#allocation7]  }
  0x63   : > { %3438 = vmatpush3.bf16.msra.mxu0 %v3568_v9  ;;  %765 = vmatpush1.bf16.msra.mxu1 %v3592_v18  ;;  %v3613_v9 = vld [vmem:[#allocation2 + $0xe8] ss:$16 sps:$4 sm:$0xff]   ;;  %s3677_s27 = sshll.u32 %s3773_s23, 4  ;;  %s3678_s27 = int_to_ptr.vmem [resolvable:$false] %s3677_s27 }
  0x64   : > { %801 = vmatprep.subr.bf16.mxu0 %v3573_v11  ;;  %766 = vmatprep.subr.bf16.mxu1 %v3593_v19  ;;  %v864_v11 = vld [vmem:[#allocation5] sm:$0xff]  ;;  %v869_v16 = vld [vmem:[#allocation5 + $0x28] sm:$0xff]  ;;  %p3675_p10 = pnand %p3674_p13, %p4168_p8  ;;  %s3679_s29 = scalar_lea.vmem %s3678_s27, 256 }
  0x65   : > { %v3163_v14 = vcombine.low %v864_v11, %v868_v12  ;;  %v3164_v15 = vcombine.high %v864_v11, %v868_v12  ;;  %v3165_v17 = vcombine.low %v865_v13, %v869_v16  ;;  %v3166_v18 = vcombine.high %v865_v13, %v869_v16  ;;  %v3125_v19 = vld [vmem:[%s4142_s4] ss:$0 sm:$0xff]  ;;  %v913_v11 = vld [vmem:[#allocation5 + $0x188] sm:$0xff]  ;;  %p3680_p2 = scmp.lt.s32.totalorder %s4093_s26, %s3678_s27  ;;  %p3681_p3 = scmp.lt.s32.totalorder %s3679_s29, %s3673_s17 }
  0x66   : > { %v917_v12 = vld [vmem:[#allocation5 + $0x1a8] sm:$0xff]  ;;  %p3676_p11 = pneg %p3675_p10 }
  0x67   : > { %767 = vmatpush1.bf16.msra.mxu1 %v3598_v20  ;;  %v3214_v16 = vcombine.high %v913_v11, %v917_v12  ;;  %p3682_p5 = por %p3681_p3, %p3680_p2 }
  0x68   : > { %768 = vmatprep.subr.bf16.mxu1 %v3599_v21 }
  0x69   : > { %p3683_p6 = pnand %p3682_p5, %p3676_p11 }
  0x6b   : > { %769 = vmatpush1.bf16.msra.mxu1 %v3604_v3  ;;  %v908_v3 = vld [vmem:[#allocation5 + $0x160] sm:$0xff] }
  0xd8   : > { %v411_v27 = vpop.permute.xlu1 %410  ;;  %v396_v28 = vpop.permute.xlu0 %395 }
  0xd9   : > { %v421_v35 = vmul.f32 %v420_v30, %v411_v27  ;;  %v407_v36 = vmul.f32 %v406_v31, %v396_v28 }
  0xdb   : > { %v423_v41 = vadd.f32 %v421_v35, %v407_v36  ;;  %v877_v35 = vld [vmem:[#allocation5 + $0x68] sm:$0xff] }
  0xdc   : > { %v415_v32 = vpop.permute.xlu1 %414  ;;  %v401_v33 = vpop.permute.xlu0 %400 }
  0xdd   : > { %v422_v37 = vmul.f32 %v420_v30, %v415_v32  ;;  %v408_v38 = vmul.f32 %v406_v31, %v401_v33  ;;  %v872_v32 = vld [vmem:[#allocation5 + $0x40] sm:$0xff] }
  0xde   : > { %v876_v33 = vld [vmem:[#allocation5 + $0x60] sm:$0xff] }
  0xdf   : > { %v424_v42 = vadd.f32 %v422_v37, %v408_v38 }
  0xe1   : > { %v431_v39 = vpop.permute.xlu1 %430  ;;  %v427_v40 = vpop.permute.xlu0 %426 }
  0xe2   : > { %v438_v43 = vmul.f32 %v436_v34, %v431_v39  ;;  %v437_v44 = vmul.f32 %v436_v34, %v427_v40  ;;  %v873_v34 = vld [vmem:[#allocation5 + $0x48] sm:$0xff]  ;;  %v3172_v39 = vcombine.high %v872_v32, %v876_v33 }
  0xe3   : > { %v3174_v40 = vcombine.high %v873_v34, %v877_v35 }
  0xe4   : > { %v440_v46 = vadd.f32 %v438_v43, %v424_v42  ;;  %v439_v47 = vadd.f32 %v437_v44, %v423_v41  ;;  %v880_v41 = vld [vmem:[#allocation5 + $0x80] sm:$0xff]  ;;  %v881_v43 = vld [vmem:[#allocation5 + $0x88] sm:$0xff] }
  0xe5   : > { %v884_v42 = vld [vmem:[#allocation5 + $0xa0] sm:$0xff]  ;;  %v885_v44 = vld [vmem:[#allocation5 + $0xa8] sm:$0xff] }
  0xe6   : > { %v449_v48 = vadd.f32 %v3124_v45, %v440_v46  ;;  %v448_v49 = vadd.f32 %v3124_v45, %v439_v47  ;;  %v3171_v45 = vcombine.low %v872_v32, %v876_v33  ;;  %v3173_v46 = vcombine.low %v873_v34, %v877_v35  ;;  %v933_v32 = vld [vmem:[#allocation5 + $0x228] sm:$0xff] }
  0xe7   : > { %v3180_v47 = vcombine.high %v880_v41, %v884_v42 }
  0xe8   : > { %v451_v50 = vmul.f32 0.01, %v449_v48  ;;  %v450_v51 = vmul.f32 0.01, %v448_v49 }
  0xea   : > { %v453_v52 = vmax.f32 %v449_v48, %v451_v50  ;;  %v452_v53 = vmax.f32 %v448_v49, %v450_v51  ;;  %v3182_v48 = vcombine.high %v881_v43, %v885_v44  ;;  %v888_v49 = vld [vmem:[#allocation5 + $0xc0] sm:$0xff]  ;;  %v889_v51 = vld [vmem:[#allocation5 + $0xc8] sm:$0xff] }
  0xeb   : > { %v892_v50 = vld [vmem:[#allocation5 + $0xe0] sm:$0xff] }
  0xec   : > { %v454_v55 = vpack.c.bf16 %v453_v52, %v452_v53  ;;  %v893_v52 = vld [vmem:[#allocation5 + $0xe8] sm:$0xff]  ;;  %v3179_v53 = vcombine.low %v880_v41, %v884_v42 }
  0xee   : > { %3440 = vmatmul.mubr.msk.bf16.vlgmr.msra.gmra.mrb[0].mxu0 %vm494_vm1, %v454_v55  ;;  %v3188_v55 = vcombine.high %v888_v49, %v892_v50 }
  0xef   : > { %802 = vmatpush1.bf16.msra.mxu0 %v3571_v54  ;;  %833 = vmatprep.mubr.bf16.mxu0 %v3768_v1  ;;  %v3605_v1 = vld [vmem:[#allocation2 + $0xc4] ss:$16 sps:$4 sm:$0xff]   ;;  %v3181_v54 = vcombine.low %v881_v43, %v885_v44 }
  0xf0   : > { %803 = vmatprep.subr.bf16.mxu0 %v3579_v56  ;;  %770 = vmatprep.subr.bf16.mxu1 %v3605_v1  ;;  %v3190_v56 = vcombine.high %v889_v51, %v893_v52  ;;  %v905_v1 = vld [vmem:[#allocation5 + $0x148] sm:$0xff] }
  0xf1   : > { %771 = vmatpush1.bf16.msra.mxu1 %v3610_v6 }
  0xf2   : > { %772 = vmatprep.subr.bf16.mxu1 %v3611_v7 }
  0xf3   : > { %804 = vmatpush1.bf16.msra.mxu0 %v3577_v57  ;;  %v896_v57 = vld [vmem:[#allocation5 + $0x100] sm:$0xff] }
  0xf4   : > { %805 = vmatprep.subr.bf16.mxu0 %v3585_v58  ;;  %v900_v58 = vld [vmem:[#allocation5 + $0x120] sm:$0xff] }
  0xf5   : > { %773 = vmatpush1.bf16.msra.mxu1 %v3616_v10  ;;  %v916_v10 = vld [vmem:[#allocation5 + $0x1a0] sm:$0xff] }
  0xf6   : > { %2442 = vmatprep.subr.bf16.mxu1 %v3164_v15 }
  0xf7   : > { %806 = vmatpush1.bf16.msra.mxu0 %v3583_v59  ;;  %v897_v59 = vld [vmem:[#allocation5 + $0x108] sm:$0xff] }
  0xf8   : > { %807 = vmatprep.subr.bf16.mxu0 %v3591_v60  ;;  %v901_v60 = vld [vmem:[#allocation5 + $0x128] sm:$0xff] }
  0xf9   : > { %v3197_v6 = vcombine.low %v897_v59, %v901_v60 }
  0xfb   : > { %808 = vmatpush1.bf16.msra.mxu0 %v3589_v61  ;;  %v3187_v61 = vcombine.low %v888_v49, %v892_v50 }
  0xfc   : > { %809 = vmatprep.subr.bf16.mxu0 %v3597_v62  ;;  %v3189_v62 = vcombine.low %v889_v51, %v893_v52 }
  0xff   : > { %810 = vmatpush1.bf16.msra.mxu0 %v3595_v63  ;;  %v3196_v63 = vcombine.high %v896_v57, %v900_v58 }
 0x100   : > { %811 = vmatprep.subr.bf16.mxu0 %v3603_v0  ;;  %v3198_v0 = vcombine.high %v897_v59, %v901_v60 }
 0x103   : > { %812 = vmatpush1.bf16.msra.mxu0 %v3601_v2  ;;  %v904_v2 = vld [vmem:[#allocation5 + $0x140] sm:$0xff] }
 0x104   : > { %813 = vmatprep.subr.bf16.mxu0 %v3609_v4  ;;  %v909_v4 = vld [vmem:[#allocation5 + $0x168] sm:$0xff]  ;;  %v3204_v7 = vcombine.high %v904_v2, %v908_v3  ;;  %v3203_v13 = vcombine.low %v904_v2, %v908_v3 }
 0x107   : > { %814 = vmatpush1.bf16.msra.mxu0 %v3607_v5  ;;  %v3195_v5 = vcombine.low %v896_v57, %v900_v58 }
 0x108   : > { %815 = vmatprep.subr.bf16.mxu0 %v3615_v8  ;;  %v3206_v8 = vcombine.high %v905_v1, %v909_v4 }
 0x10b   : > { %816 = vmatpush1.bf16.msra.mxu0 %v3613_v9  ;;  %v912_v9 = vld [vmem:[#allocation5 + $0x180] sm:$0xff] }
 0x10c   : > { %2528 = vmatprep.subr.bf16.mxu0 %v3166_v18  ;;  %v3212_v15 = vcombine.high %v912_v9, %v916_v10  ;;  %v924_v18 = vld [vmem:[#allocation5 + $0x1e0] sm:$0xff] }
 0x1c1   : > { %v532_v20 = vpop.f32.mrb[0].mxu0 }
 0x1c2   : > { %v533_v21 = vadd.f32 %v3125_v19, %v532_v20  ;;  %v3441_v22 = vpop.f32.mrb[1].mxu0  ;;  %v925_v20 = vld [vmem:[#allocation5 + $0x1e8] sm:$0xff] }
 0x1c3   : > { %v535_v26 = vpop.f32.mrb[2].mxu0  ;;  %v3213_v22 = vcombine.low %v913_v11, %v917_v12  ;;  %v973_v11 = vld [vmem:[#allocation5 + $0x368] sm:$0xff] }
 0x1c4   : > { %v539_v27 = vmul.f32 0.01, %v533_v21  ;;  %v536_v28 = vadd.f32 %v3125_v19, %v535_v26  ;;  %v3442_v30 = vpop.f32.mrb[3].mxu0  ;;  %v921_v19 = vld [vmem:[#allocation5 + $0x1c8] sm:$0xff] }
 0x1c5   : > { %v932_v30 = vld [vmem:[#allocation5 + $0x220] sm:$0xff]  ;;  %v3221_v34 = vcombine.low %v921_v19, %v925_v20 }
 0x1c6   : > { %v540_v31 = vmul.f32 0.01, %v536_v28  ;;  %v541_v36 = vmax.f32 %v533_v21, %v539_v27  ;;  %v3211_v21 = vcombine.low %v912_v9, %v916_v10  ;;  %v3222_v27 = vcombine.high %v921_v19, %v925_v20  ;;  %v969_v9 = vld [vmem:[#allocation5 + $0x348] sm:$0xff] }
 0x1c7   : > { %v981_v19 = vld [vmem:[#allocation5 + $0x3a8] sm:$0xff] }
 0x1c8   : > { %v542_v37 = vmax.f32 %v536_v28, %v540_v31  ;;  %v928_v28 = vld [vmem:[#allocation5 + $0x200] sm:$0xff]  ;;  %v929_v31 = vld [vmem:[#allocation5 + $0x208] sm:$0xff] }
 0x1c9   : > { %v3228_v35 = vcombine.high %v928_v28, %v932_v30  ;;  %v3227_v41 = vcombine.low %v928_v28, %v932_v30  ;;  %v3229_v42 = vcombine.low %v929_v31, %v933_v32  ;;  %v985_v28 = vld [vmem:[#allocation5 + $0x3c8] sm:$0xff] }
 0x1ca   : > { %v543_v38 = vpack.c.bf16 %v542_v37, %v541_v36  ;;  %v3230_v36 = vcombine.high %v929_v31, %v933_v32  ;;  %v936_v37 = vld [vmem:[#allocation5 + $0x240] sm:$0xff]  ;;  %v989_v31 = vld [vmem:[#allocation5 + $0x3e8] sm:$0xff] }
 0x1cc   : > { %791 = vmatmul.mubr.bf16.vlgmr.msra.gmra.mrb[0].mxu1 %v543_v38  ;;  %834 = vmatmul.mubr.bf16.vlgmr.msra.gmra.mrb[4].mxu0 %v543_v38  ;;  %v940_v38 = vld [vmem:[#allocation5 + $0x260] sm:$0xff] }
 0x1cd   : > { %2443 = vmatpush1.bf16.msra.mxu1 %v3163_v14  ;;  %2529 = vmatpush1.bf16.msra.mxu0 %v3165_v17  ;;  %v3205_v14 = vcombine.low %v905_v1, %v909_v4  ;;  %v920_v17 = vld [vmem:[#allocation5 + $0x1c0] sm:$0xff]  ;;  %v3236_v43 = vcombine.high %v936_v37, %v940_v38  ;;  %v3235_v49 = vcombine.low %v936_v37, %v940_v38  ;;  %v4001_v37 = vld [vmem:[#allocation5 + $0x408] sm:$0xff] }
 0x1ce   : > { %2444 = vmatprep.subr.bf16.mxu1 %v3172_v39  ;;  %2530 = vmatprep.subr.bf16.mxu0 %v3174_v40  ;;  %v3220_v26 = vcombine.high %v920_v17, %v924_v18  ;;  %v3219_v33 = vcombine.low %v920_v17, %v924_v18  ;;  %v937_v39 = vld [vmem:[#allocation5 + $0x248] sm:$0xff] }
 0x1cf   : > { %v941_v40 = vld [vmem:[#allocation5 + $0x268] sm:$0xff] }
 0x1d0   : > { %v3238_v44 = vcombine.high %v937_v39, %v941_v40  ;;  %v3237_v50 = vcombine.low %v937_v39, %v941_v40  ;;  %v977_v17 = vld [vmem:[#allocation5 + $0x388] sm:$0xff] }
 0x1d1   : > { %2445 = vmatpush1.bf16.msra.mxu1 %v3171_v45  ;;  %2531 = vmatpush1.bf16.msra.mxu0 %v3173_v46  ;;  %v944_v45 = vld [vmem:[#allocation5 + $0x280] sm:$0xff]  ;;  %v4005_v39 = vld [vmem:[#allocation5 + $0x428] sm:$0xff] }
 0x1d2   : > { %2446 = vmatprep.subr.bf16.mxu1 %v3180_v47  ;;  %2532 = vmatprep.subr.bf16.mxu0 %v3182_v48  ;;  %v948_v46 = vld [vmem:[#allocation5 + $0x2a0] sm:$0xff]  ;;  %v945_v47 = vld [vmem:[#allocation5 + $0x288] sm:$0xff] }
 0x1d3   : > { %v949_v48 = vld [vmem:[#allocation5 + $0x2a8] sm:$0xff]  ;;  %v3244_v51 = vcombine.high %v944_v45, %v948_v46  ;;  %v3243_v57 = vcombine.low %v944_v45, %v948_v46 }
 0x1d4   : > { %v3246_v52 = vcombine.high %v945_v47, %v949_v48  ;;  %v3245_v58 = vcombine.low %v945_v47, %v949_v48 }
 0x1d5   : > { %2447 = vmatpush1.bf16.msra.mxu1 %v3179_v53  ;;  %2533 = vmatpush1.bf16.msra.mxu0 %v3181_v54  ;;  %v952_v53 = vld [vmem:[#allocation5 + $0x2c0] sm:$0xff] }
 0x1d6   : > { %2448 = vmatprep.subr.bf16.mxu1 %v3188_v55  ;;  %2534 = vmatprep.subr.bf16.mxu0 %v3190_v56  ;;  %v956_v54 = vld [vmem:[#allocation5 + $0x2e0] sm:$0xff]  ;;  %v953_v55 = vld [vmem:[#allocation5 + $0x2c8] sm:$0xff] }
 0x1d7   : > { %v957_v56 = vld [vmem:[#allocation5 + $0x2e8] sm:$0xff]  ;;  %v3252_v59 = vcombine.high %v952_v53, %v956_v54  ;;  %v3251_v2 = vcombine.low %v952_v53, %v956_v54 }
 0x1d8   : > { %v3254_v60 = vcombine.high %v953_v55, %v957_v56  ;;  %v3253_v3 = vcombine.low %v953_v55, %v957_v56 }
 0x1d9   : > { %2449 = vmatpush1.bf16.msra.mxu1 %v3187_v61  ;;  %2535 = vmatpush1.bf16.msra.mxu0 %v3189_v62  ;;  %v960_v61 = vld [vmem:[#allocation5 + $0x300] sm:$0xff] }
 0x1da   : > { %2450 = vmatprep.subr.bf16.mxu1 %v3196_v63  ;;  %2536 = vmatprep.subr.bf16.mxu0 %v3198_v0  ;;  %v964_v62 = vld [vmem:[#allocation5 + $0x320] sm:$0xff]  ;;  %v961_v63 = vld [vmem:[#allocation5 + $0x308] sm:$0xff] }
 0x1db   : > { %v965_v0 = vld [vmem:[#allocation5 + $0x328] sm:$0xff]  ;;  %v3260_v1 = vcombine.high %v960_v61, %v964_v62 }
 0x1dc   : > { %v3262_v4 = vcombine.high %v961_v63, %v965_v0 }
 0x1dd   : > { %2451 = vmatpush1.bf16.msra.mxu1 %v3195_v5  ;;  %2537 = vmatpush1.bf16.msra.mxu0 %v3197_v6  ;;  %v3259_v5 = vcombine.low %v960_v61, %v964_v62  ;;  %v3261_v6 = vcombine.low %v961_v63, %v965_v0 }
 0x1de   : > { %2452 = vmatprep.subr.bf16.mxu1 %v3204_v7  ;;  %2538 = vmatprep.subr.bf16.mxu0 %v3206_v8  ;;  %v968_v7 = vld [vmem:[#allocation5 + $0x340] sm:$0xff] }
 0x1df   : > { %v972_v8 = vld [vmem:[#allocation5 + $0x360] sm:$0xff] }
 0x1e0   : > { %v3268_v10 = vcombine.high %v968_v7, %v972_v8  ;;  %v3267_v12 = vcombine.low %v968_v7, %v972_v8 }
 0x1e1   : > { %2453 = vmatpush1.bf16.msra.mxu1 %v3203_v13  ;;  %2539 = vmatpush1.bf16.msra.mxu0 %v3205_v14  ;;  %v3269_v13 = vcombine.low %v969_v9, %v973_v11  ;;  %v3270_v14 = vcombine.high %v969_v9, %v973_v11 }
 0x1e2   : > { %2454 = vmatprep.subr.bf16.mxu1 %v3212_v15  ;;  %2540 = vmatprep.subr.bf16.mxu0 %v3214_v16  ;;  %v976_v15 = vld [vmem:[#allocation5 + $0x380] sm:$0xff] }
 0x1e3   : > { %v980_v16 = vld [vmem:[#allocation5 + $0x3a0] sm:$0xff] }
 0x1e4   : > { %v3276_v18 = vcombine.high %v976_v15, %v980_v16  ;;  %v3275_v20 = vcombine.low %v976_v15, %v980_v16 }
 0x1e5   : > { %2455 = vmatpush1.bf16.msra.mxu1 %v3211_v21  ;;  %2541 = vmatpush1.bf16.msra.mxu0 %v3213_v22  ;;  %v3277_v21 = vcombine.low %v977_v17, %v981_v19  ;;  %v3278_v22 = vcombine.high %v977_v17, %v981_v19  ;;  %v1000_v17 = vld [vmem:[#allocation5 + $0x440] sm:$0xff] }
 0x1e6   : > { %2456 = vmatprep.subr.bf16.mxu1 %v3220_v26  ;;  %2542 = vmatprep.subr.bf16.mxu0 %v3222_v27  ;;  %v984_v26 = vld [vmem:[#allocation5 + $0x3c0] sm:$0xff] }
 0x1e7   : > { %v988_v27 = vld [vmem:[#allocation5 + $0x3e0] sm:$0xff] }
 0x1e8   : > { %v3284_v30 = vcombine.high %v984_v26, %v988_v27  ;;  %v3283_v32 = vcombine.low %v984_v26, %v988_v27 }
 0x1e9   : > { %2457 = vmatpush1.bf16.msra.mxu1 %v3219_v33  ;;  %2543 = vmatpush1.bf16.msra.mxu0 %v3221_v34  ;;  %v3285_v33 = vcombine.low %v985_v28, %v989_v31  ;;  %v3286_v34 = vcombine.high %v985_v28, %v989_v31  ;;  %v1008_v28 = vld [vmem:[#allocation5 + $0x480] sm:$0xff] }
 0x1ea   : > { %2458 = vmatprep.subr.bf16.mxu1 %v3228_v35  ;;  %2544 = vmatprep.subr.bf16.mxu0 %v3230_v36  ;;  %v3997_v35 = vld [vmem:[#allocation5 + $0x400] sm:$0xff] }
 0x1eb   : > { %v3999_v36 = vld [vmem:[#allocation5 + $0x420] sm:$0xff] }
 0x1ec   : > { %v3292_v38 = vcombine.high %v3997_v35, %v3999_v36  ;;  %v3291_v40 = vcombine.low %v3997_v35, %v3999_v36 }
 0x1ed   : > { %2459 = vmatpush1.bf16.msra.mxu1 %v3227_v41  ;;  %2545 = vmatpush1.bf16.msra.mxu0 %v3229_v42  ;;  %v3293_v41 = vcombine.low %v4001_v37, %v4005_v39  ;;  %v3294_v42 = vcombine.high %v4001_v37, %v4005_v39  ;;  %v1016_v39 = vld [vmem:[#allocation5 + $0x4c0] sm:$0xff] }
 0x1ee   : > { %2460 = vmatprep.subr.bf16.mxu1 %v3236_v43  ;;  %2546 = vmatprep.subr.bf16.mxu0 %v3238_v44  ;;  %v576_v43 = vld [vmem:[%s4144_s6] sm:$0xf]  ;;  %v592_v44 = vsub.s32 3, %v3973_v23 }
 0x1ef   : > { %v581_v45 = vrot.slane %v576_v43, %v3979_v25  ;;  %v589_v46 = vrot.slane %v576_v43, %v3985_v29  ;;  %v585_v47 = vrot.slane %v576_v43, %v3976_v24 }
 0x1f0   : > { %v593_v48 = vrot.slane %v576_v43, %v592_v44  ;;  %v1017_v43 = vld [vmem:[#allocation5 + $0x4c8] sm:$0xff] }
 0x1f1   : > { %2461 = vmatpush1.bf16.msra.mxu1 %v3235_v49  ;;  %2547 = vmatpush1.bf16.msra.mxu0 %v3237_v50 }
 0x1f2   : > { %2462 = vmatprep.subr.bf16.mxu1 %v3244_v51  ;;  %2548 = vmatprep.subr.bf16.mxu0 %v3246_v52 }
 0x1f5   : > { %2463 = vmatpush1.bf16.msra.mxu1 %v3243_v57  ;;  %2549 = vmatpush1.bf16.msra.mxu0 %v3245_v58 }
 0x1f6   : > { %2464 = vmatprep.subr.bf16.mxu1 %v3252_v59  ;;  %2550 = vmatprep.subr.bf16.mxu0 %v3254_v60 }
 0x1f9   : > { %2465 = vmatpush1.bf16.msra.mxu1 %v3251_v2  ;;  %2551 = vmatpush1.bf16.msra.mxu0 %v3253_v3 }
 0x1fa   : > { %2466 = vmatprep.subr.bf16.mxu1 %v3260_v1  ;;  %2552 = vmatprep.subr.bf16.mxu0 %v3262_v4 }
 0x1fd   : > { %2467 = vmatpush1.bf16.msra.mxu1 %v3259_v5  ;;  %2553 = vmatpush1.bf16.msra.mxu0 %v3261_v6 }
 0x1fe   : > { %2468 = vmatprep.subr.bf16.mxu1 %v3268_v10  ;;  %2554 = vmatprep.subr.bf16.mxu0 %v3270_v14 }
 0x201   : > { %2469 = vmatpush1.bf16.msra.mxu1 %v3267_v12  ;;  %2555 = vmatpush1.bf16.msra.mxu0 %v3269_v13 }
 0x202   : > { %2470 = vmatprep.subr.bf16.mxu1 %v3276_v18  ;;  %2556 = vmatprep.subr.bf16.mxu0 %v3278_v22  ;;  %v1005_v22 = vld [vmem:[#allocation5 + $0x468] sm:$0xff] }
 0x205   : > { %2471 = vmatpush1.bf16.msra.mxu1 %v3275_v20  ;;  %2557 = vmatpush1.bf16.msra.mxu0 %v3277_v21  ;;  %v1004_v20 = vld [vmem:[#allocation5 + $0x460] sm:$0xff]  ;;  %v1001_v21 = vld [vmem:[#allocation5 + $0x448] sm:$0xff] }
 0x206   : > { %2472 = vmatprep.subr.bf16.mxu1 %v3284_v30  ;;  %2558 = vmatprep.subr.bf16.mxu0 %v3286_v34  ;;  %v3300_v30 = vcombine.high %v1000_v17, %v1004_v20  ;;  %v3302_v31 = vcombine.high %v1001_v21, %v1005_v22  ;;  %v1013_v34 = vld [vmem:[#allocation5 + $0x4a8] sm:$0xff]  ;;  %v3299_v35 = vcombine.low %v1000_v17, %v1004_v20  ;;  %v1060_v17 = vld [vmem:[#allocation5 + $0x620] sm:$0xff] }
 0x207   : > { %v3301_v36 = vcombine.low %v1001_v21, %v1005_v22  ;;  %v1057_v20 = vld [vmem:[#allocation5 + $0x608] sm:$0xff] }
 0x208   : > { %v1061_v21 = vld [vmem:[#allocation5 + $0x628] sm:$0xff] }
 0x209   : > { %2473 = vmatpush1.bf16.msra.mxu1 %v3283_v32  ;;  %2559 = vmatpush1.bf16.msra.mxu0 %v3285_v33  ;;  %v1012_v32 = vld [vmem:[#allocation5 + $0x4a0] sm:$0xff]  ;;  %v1009_v33 = vld [vmem:[#allocation5 + $0x488] sm:$0xff] }
 0x20a   : > { %2485 = vmatprep.subr.bf16.mxu1 %v3292_v38  ;;  %2571 = vmatprep.subr.bf16.mxu0 %v3294_v42  ;;  %v3308_v37 = vcombine.high %v1008_v28, %v1012_v32  ;;  %v3310_v38 = vcombine.high %v1009_v33, %v1013_v34  ;;  %v1020_v42 = vld [vmem:[#allocation5 + $0x4e0] sm:$0xff] }
 0x29f   : > { %v792_v49 = vpop.f32.mrb[0].mxu1  ;;  %v835_v50 = vpop.f32.mrb[4].mxu0 }
 0x2a0   : > { %v793_v51 = vadd.f32 %v792_v49, %v581_v45  ;;  %v836_v52 = vadd.f32 %v835_v50, %v589_v46  ;;  %v794_v53 = vpop.f32.mrb[1].mxu1  ;;  %v837_v54 = vpop.f32.mrb[5].mxu0  ;;  %v1028_v49 = vld [vmem:[#allocation5 + $0x520] sm:$0xff]  ;;  %v1025_v50 = vld [vmem:[#allocation5 + $0x508] sm:$0xff] }
 0x2a1   : > { %v795_v55 = vadd.f32 %v794_v53, %v585_v47  ;;  %v838_v56 = vadd.f32 %v837_v54, %v593_v48  ;;  %v796_v57 = vpop.f32.mrb[2].mxu1  ;;  %v839_v58 = vpop.f32.mrb[6].mxu0 }
 0x2a2   : > { %v844_v59 = vmul.f32 0.01, %v793_v51  ;;  %v846_v60 = vmul.f32 0.01, %v836_v52  ;;  %v797_v61 = vadd.f32 %v796_v57, %v581_v45  ;;  %v840_v62 = vadd.f32 %v839_v58, %v589_v46  ;;  %v798_v63 = vpop.f32.mrb[3].mxu1  ;;  %v841_v0 = vpop.f32.mrb[7].mxu0 }
 0x2a3   : > { %v845_v2 = vmul.f32 0.01, %v795_v55  ;;  %v847_v3 = vmul.f32 0.01, %v838_v56  ;;  %v799_v1 = vadd.f32 %v798_v63, %v585_v47  ;;  %v842_v4 = vadd.f32 %v841_v0, %v593_v48  ;;  %v1021_v45 = vld [vmem:[#allocation5 + $0x4e8] sm:$0xff]  ;;  %v1024_v48 = vld [vmem:[#allocation5 + $0x500] sm:$0xff] }
 0x2a4   : > { %v848_v5 = vmul.f32 0.01, %v797_v61  ;;  %v850_v6 = vmul.f32 0.01, %v840_v62  ;;  %v852_v9 = vmax.f32 %v793_v51, %v844_v59  ;;  %v854_v10 = vmax.f32 %v836_v52, %v846_v60  ;;  %v1029_v51 = vld [vmem:[#allocation5 + $0x528] sm:$0xff]  ;;  %v1036_v57 = vld [vmem:[#allocation5 + $0x560] sm:$0xff] }
 0x2a5   : > { %v849_v7 = vmul.f32 0.01, %v799_v1  ;;  %v851_v8 = vmul.f32 0.01, %v842_v4  ;;  %v853_v13 = vmax.f32 %v795_v55, %v845_v2  ;;  %v855_v14 = vmax.f32 %v838_v56, %v847_v3  ;;  %v1032_v56 = vld [vmem:[#allocation5 + $0x540] sm:$0xff]  ;;  %v1033_v58 = vld [vmem:[#allocation5 + $0x548] sm:$0xff] }
 0x2a6   : > { %v856_v11 = vmax.f32 %v797_v61, %v848_v5  ;;  %v858_v12 = vmax.f32 %v840_v62, %v850_v6  ;;  %v3307_v46 = vcombine.low %v1008_v28, %v1012_v32  ;;  %v3309_v47 = vcombine.low %v1009_v33, %v1013_v34  ;;  %v1037_v59 = vld [vmem:[#allocation5 + $0x568] sm:$0xff]  ;;  %v1040_v0 = vld [vmem:[#allocation5 + $0x580] sm:$0xff] }
 0x2a7   : > { %v857_v15 = vmax.f32 %v799_v1, %v849_v7  ;;  %v859_v16 = vmax.f32 %v842_v4, %v851_v8  ;;  %v3315_v52 = vcombine.low %v1016_v39, %v1020_v42  ;;  %v3317_v53 = vcombine.low %v1017_v43, %v1021_v45  ;;  %v1044_v2 = vld [vmem:[#allocation5 + $0x5a0] sm:$0xff]  ;;  %v1041_v3 = vld [vmem:[#allocation5 + $0x588] sm:$0xff] }
 0x2a8   : > { %v4022_v18 = vpack.c.bf16 %v856_v11, %v852_v9  ;;  %v4024_v19 = vpack.c.bf16 %v858_v12, %v854_v10  ;;  %v3324_v54 = vcombine.high %v1024_v48, %v1028_v49  ;;  %v3326_v55 = vcombine.high %v1025_v50, %v1029_v51  ;;  %v1045_v1 = vld [vmem:[#allocation5 + $0x5a8] sm:$0xff]  ;;  %v1048_v8 = vld [vmem:[#allocation5 + $0x5c0] sm:$0xff] }
 0x2a9   : > { %v4026_v26 = vpack.c.bf16 %v857_v15, %v853_v13  ;;  %v4028_v27 = vpack.c.bf16 %v859_v16, %v855_v14  ;;  %v3323_v60 = vcombine.low %v1024_v48, %v1028_v49  ;;  %v3325_v61 = vcombine.low %v1025_v50, %v1029_v51  ;;  %v1052_v9 = vld [vmem:[#allocation5 + $0x5e0] sm:$0xff]  ;;  %v1049_v10 = vld [vmem:[#allocation5 + $0x5c8] sm:$0xff] }
 0x2aa   : > { %v3332_v62 = vcombine.high %v1032_v56, %v1036_v57  ;;  %v3334_v63 = vcombine.high %v1033_v58, %v1037_v59  ;;  %v3331_v4 = vcombine.low %v1032_v56, %v1036_v57  ;;  %v3333_v5 = vcombine.low %v1033_v58, %v1037_v59  ;;  %v1053_v11 = vld [vmem:[#allocation5 + $0x5e8] sm:$0xff]  ;;  %v1056_v16 = vld [vmem:[#allocation5 + $0x600] sm:$0xff] }
 0x2ab   : > { %2474 = vmatprep.mubr.bf16.mxu1 %v4026_v26  ;;  %2560 = vmatprep.mubr.bf16.mxu0 %v4026_v26  ;;  %v3340_v6 = vcombine.high %v1040_v0, %v1044_v2  ;;  %v3342_v7 = vcombine.high %v1041_v3, %v1045_v1  ;;  %v3339_v12 = vcombine.low %v1040_v0, %v1044_v2  ;;  %v1064_v32 = vld [vmem:[#allocation5 + $0x640] sm:$0xff]  ;;  %v1065_v34 = vld [vmem:[#allocation5 + $0x648] sm:$0xff] }
 0x2ac   : > { %2475 = vmatmul.mubr.bf16.vlgmr.msra.gmra.mrb[4].mxu1 %v4022_v18  ;;  %2561 = vmatmul.mubr.bf16.vlgmr.msra.gmra.mrb[8].mxu0 %v4022_v18  ;;  %v3341_v13 = vcombine.low %v1041_v3, %v1045_v1  ;;  %v3348_v14 = vcombine.high %v1048_v8, %v1052_v9  ;;  %v3350_v15 = vcombine.high %v1049_v10, %v1053_v11  ;;  %v1068_v33 = vld [vmem:[#allocation5 + $0x660] sm:$0xff]  ;;  %v1081_v51 = vld [vmem:[#allocation5 + $0x6c8] sm:$0xff] }
 0x2ad   : > { %2486 = vmatpush1.bf16.msra.mxu1 %v3291_v40  ;;  %2572 = vmatpush1.bf16.msra.mxu0 %v3293_v41  ;;  %v3316_v40 = vcombine.high %v1016_v39, %v1020_v42  ;;  %v3318_v41 = vcombine.high %v1017_v43, %v1021_v45  ;;  %v3347_v22 = vcombine.low %v1048_v8, %v1052_v9  ;;  %v1072_v42 = vld [vmem:[#allocation5 + $0x680] sm:$0xff]  ;;  %v1073_v45 = vld [vmem:[#allocation5 + $0x688] sm:$0xff] }
 0x2ae   : > { %2517 = vmatprep.mubr.bf16.mxu1 %v4028_v27  ;;  %2603 = vmatprep.mubr.bf16.mxu0 %v4028_v27  ;;  %v3349_v28 = vcombine.low %v1049_v10, %v1053_v11  ;;  %v1076_v43 = vld [vmem:[#allocation5 + $0x6a0] sm:$0xff]  ;;  %v1089_v59 = vld [vmem:[#allocation5 + $0x708] sm:$0xff] }
 0x2af   : > { %2487 = vmatprep.subr.bf16.mxu1 %v3300_v30  ;;  %2573 = vmatprep.subr.bf16.mxu0 %v3302_v31  ;;  %v3356_v30 = vcombine.high %v1056_v16, %v1060_v17  ;;  %v3358_v31 = vcombine.high %v1057_v20, %v1061_v21  ;;  %v1080_v49 = vld [vmem:[#allocation5 + $0x6c0] sm:$0xff]  ;;  %v1097_v1 = vld [vmem:[#allocation5 + $0x748] sm:$0xff] }
 0x2b0   : > { %v1084_v50 = vld [vmem:[#allocation5 + $0x6e0] sm:$0xff]  ;;  %v1105_v11 = vld [vmem:[#allocation5 + $0x788] sm:$0xff] }
 0x2b1   : > { %2488 = vmatpush1.bf16.msra.mxu1 %v3299_v35  ;;  %2574 = vmatpush1.bf16.msra.mxu0 %v3301_v36  ;;  %v1069_v35 = vld [vmem:[#allocation5 + $0x668] sm:$0xff]  ;;  %v3355_v36 = vcombine.low %v1056_v16, %v1060_v17  ;;  %v1088_v57 = vld [vmem:[#allocation5 + $0x700] sm:$0xff] }
 0x2b2   : > { %2489 = vmatprep.subr.bf16.mxu1 %v3308_v37  ;;  %2575 = vmatprep.subr.bf16.mxu0 %v3310_v38  ;;  %v3357_v37 = vcombine.low %v1057_v20, %v1061_v21  ;;  %v3364_v38 = vcombine.high %v1064_v32, %v1068_v33  ;;  %v3366_v39 = vcombine.high %v1065_v34, %v1069_v35  ;;  %v1092_v58 = vld [vmem:[#allocation5 + $0x720] sm:$0xff]  ;;  %v1113_v21 = vld [vmem:[#allocation5 + $0x7c8] sm:$0xff] }
 0x2b3   : > { %v1096_v2 = vld [vmem:[#allocation5 + $0x740] sm:$0xff] }
 0x2b4   : > { %v1100_v3 = vld [vmem:[#allocation5 + $0x760] sm:$0xff] }
 0x2b5   : > { %2490 = vmatpush1.bf16.msra.mxu1 %v3307_v46  ;;  %2576 = vmatpush1.bf16.msra.mxu0 %v3309_v47  ;;  %v1077_v46 = vld [vmem:[#allocation5 + $0x6a8] sm:$0xff]  ;;  %v3363_v47 = vcombine.low %v1064_v32, %v1068_v33  ;;  %v1104_v9 = vld [vmem:[#allocation5 + $0x780] sm:$0xff]  ;;  %v866_v33 = vld [vmem:[#allocation5 + $0x10] sm:$0xff] }
 0x2b6   : > { %2491 = vmatprep.subr.bf16.mxu1 %v3316_v40  ;;  %2577 = vmatprep.subr.bf16.mxu0 %v3318_v41  ;;  %v3365_v40 = vcombine.low %v1065_v34, %v1069_v35  ;;  %v3372_v41 = vcombine.high %v1072_v42, %v1076_v43  ;;  %v3374_v48 = vcombine.high %v1073_v45, %v1077_v46  ;;  %v1108_v10 = vld [vmem:[#allocation5 + $0x7a0] sm:$0xff]  ;;  %v870_v34 = vld [vmem:[#allocation5 + $0x30] sm:$0xff]  ;;  %v867_v35 = vld [vmem:[#allocation5 + $0x18] sm:$0xff] }
 0x2b7   : > { %v1112_v17 = vld [vmem:[#allocation5 + $0x7c0] sm:$0xff] }
 0x2b8   : > { %v1116_v20 = vld [vmem:[#allocation5 + $0x7e0] sm:$0xff] }
 0x2b9   : > { %2492 = vmatpush1.bf16.msra.mxu1 %v3315_v52  ;;  %2578 = vmatpush1.bf16.msra.mxu0 %v3317_v53  ;;  %v1085_v52 = vld [vmem:[#allocation5 + $0x6e8] sm:$0xff]  ;;  %v3371_v53 = vcombine.low %v1072_v42, %v1076_v43  ;;  %v874_v43 = vld [vmem:[#allocation5 + $0x50] sm:$0xff] }
 0x2ba   : > { %2493 = vmatprep.subr.bf16.mxu1 %v3324_v54  ;;  %2579 = vmatprep.subr.bf16.mxu0 %v3326_v55  ;;  %v3373_v54 = vcombine.low %v1073_v45, %v1077_v46  ;;  %v3380_v55 = vcombine.high %v1080_v49, %v1084_v50  ;;  %v3382_v56 = vcombine.high %v1081_v51, %v1085_v52  ;;  %v878_v45 = vld [vmem:[#allocation5 + $0x70] sm:$0xff]  ;;  %v875_v46 = vld [vmem:[#allocation5 + $0x58] sm:$0xff] }
 0x2bd   : > { %2494 = vmatpush1.bf16.msra.mxu1 %v3323_v60  ;;  %2580 = vmatpush1.bf16.msra.mxu0 %v3325_v61  ;;  %v1093_v60 = vld [vmem:[#allocation5 + $0x728] sm:$0xff]  ;;  %v3379_v61 = vcombine.low %v1080_v49, %v1084_v50  ;;  %v882_v50 = vld [vmem:[#allocation5 + $0x90] sm:$0xff] }
 0x2be   : > { %2495 = vmatprep.subr.bf16.mxu1 %v3332_v62  ;;  %2581 = vmatprep.subr.bf16.mxu0 %v3334_v63  ;;  %v3381_v62 = vcombine.low %v1081_v51, %v1085_v52  ;;  %v3388_v63 = vcombine.high %v1088_v57, %v1092_v58  ;;  %v3390_v0 = vcombine.high %v1089_v59, %v1093_v60  ;;  %v886_v51 = vld [vmem:[#allocation5 + $0xb0] sm:$0xff]  ;;  %v883_v52 = vld [vmem:[#allocation5 + $0x98] sm:$0xff] }
 0x2c1   : > { %2496 = vmatpush1.bf16.msra.mxu1 %v3331_v4  ;;  %2582 = vmatpush1.bf16.msra.mxu0 %v3333_v5  ;;  %v1101_v4 = vld [vmem:[#allocation5 + $0x768] sm:$0xff]  ;;  %v3387_v5 = vcombine.low %v1088_v57, %v1092_v58  ;;  %v890_v58 = vld [vmem:[#allocation5 + $0xd0] sm:$0xff] }
 0x2c2   : > { %2497 = vmatprep.subr.bf16.mxu1 %v3340_v6  ;;  %2583 = vmatprep.subr.bf16.mxu0 %v3342_v7  ;;  %v3389_v6 = vcombine.low %v1089_v59, %v1093_v60  ;;  %v3396_v7 = vcombine.high %v1096_v2, %v1100_v3  ;;  %v3398_v8 = vcombine.high %v1097_v1, %v1101_v4  ;;  %v894_v59 = vld [vmem:[#allocation5 + $0xf0] sm:$0xff]  ;;  %v891_v60 = vld [vmem:[#allocation5 + $0xd8] sm:$0xff] }
 0x2c5   : > { %2498 = vmatpush1.bf16.msra.mxu1 %v3339_v12  ;;  %2584 = vmatpush1.bf16.msra.mxu0 %v3341_v13  ;;  %v1109_v12 = vld [vmem:[#allocation5 + $0x7a8] sm:$0xff]  ;;  %v3395_v13 = vcombine.low %v1096_v2, %v1100_v3  ;;  %v898_v3 = vld [vmem:[#allocation5 + $0x110] sm:$0xff] }
 0x2c6   : > { %2499 = vmatprep.subr.bf16.mxu1 %v3348_v14  ;;  %2585 = vmatprep.subr.bf16.mxu0 %v3350_v15  ;;  %v3397_v14 = vcombine.low %v1097_v1, %v1101_v4  ;;  %v3404_v15 = vcombine.high %v1104_v9, %v1108_v10  ;;  %v3406_v16 = vcombine.high %v1105_v11, %v1109_v12  ;;  %v902_v1 = vld [vmem:[#allocation5 + $0x130] sm:$0xff]  ;;  %v903_v4 = vld [vmem:[#allocation5 + $0x138] sm:$0xff] }
 0x2c9   : > { %2500 = vmatpush1.bf16.msra.mxu1 %v3347_v22  ;;  %2586 = vmatpush1.bf16.msra.mxu0 %v3349_v28  ;;  %v1117_v22 = vld [vmem:[#allocation5 + $0x7e8] sm:$0xff]  ;;  %v3403_v28 = vcombine.low %v1104_v9, %v1108_v10  ;;  %v906_v9 = vld [vmem:[#allocation5 + $0x150] sm:$0xff] }
 0x2ca   : > { %2501 = vmatprep.subr.bf16.mxu1 %v3356_v30  ;;  %2587 = vmatprep.subr.bf16.mxu0 %v3358_v31  ;;  %v3405_v30 = vcombine.low %v1105_v11, %v1109_v12  ;;  %v3412_v31 = vcombine.high %v1112_v17, %v1116_v20  ;;  %v3414_v32 = vcombine.high %v1113_v21, %v1117_v22  ;;  %v910_v10 = vld [vmem:[#allocation5 + $0x170] sm:$0xff]  ;;  %v907_v11 = vld [vmem:[#allocation5 + $0x158] sm:$0xff] }
 0x2cb   : > { %v911_v12 = vld [vmem:[#allocation5 + $0x178] sm:$0xff] }
 0x2cd   : > { %2502 = vmatpush1.bf16.msra.mxu1 %v3355_v36  ;;  %2588 = vmatpush1.bf16.msra.mxu0 %v3357_v37  ;;  %v871_v36 = vld [vmem:[#allocation5 + $0x38] sm:$0xff]  ;;  %v3411_v37 = vcombine.low %v1112_v17, %v1116_v20  ;;  %v914_v17 = vld [vmem:[#allocation5 + $0x190] sm:$0xff] }
 0x2ce   : > { %2503 = vmatprep.subr.bf16.mxu1 %v3364_v38  ;;  %2589 = vmatprep.subr.bf16.mxu0 %v3366_v39  ;;  %v3413_v38 = vcombine.low %v1113_v21, %v1117_v22  ;;  %v3168_v39 = vcombine.high %v866_v33, %v870_v34  ;;  %v3170_v42 = vcombine.high %v867_v35, %v871_v36  ;;  %v918_v20 = vld [vmem:[#allocation5 + $0x1b0] sm:$0xff]  ;;  %v915_v21 = vld [vmem:[#allocation5 + $0x198] sm:$0xff] }
 0x2cf   : > { %v919_v22 = vld [vmem:[#allocation5 + $0x1b8] sm:$0xff] }
 0x2d1   : > { %2504 = vmatpush1.bf16.msra.mxu1 %v3363_v47  ;;  %2590 = vmatpush1.bf16.msra.mxu0 %v3365_v40  ;;  %v879_v47 = vld [vmem:[#allocation5 + $0x78] sm:$0xff]  ;;  %v3167_v40 = vcombine.low %v866_v33, %v870_v34  ;;  %v922_v33 = vld [vmem:[#allocation5 + $0x1d0] sm:$0xff] }
 0x2d2   : > { %2505 = vmatprep.subr.bf16.mxu1 %v3372_v41  ;;  %2591 = vmatprep.subr.bf16.mxu0 %v3374_v48  ;;  %v3169_v41 = vcombine.low %v867_v35, %v871_v36  ;;  %v3176_v48 = vcombine.high %v874_v43, %v878_v45  ;;  %v3178_v49 = vcombine.high %v875_v46, %v879_v47  ;;  %v926_v34 = vld [vmem:[#allocation5 + $0x1f0] sm:$0xff]  ;;  %v923_v35 = vld [vmem:[#allocation5 + $0x1d8] sm:$0xff] }
 0x2d3   : > { %v927_v36 = vld [vmem:[#allocation5 + $0x1f8] sm:$0xff] }
 0x2d5   : > { %2506 = vmatpush1.bf16.msra.mxu1 %v3371_v53  ;;  %2592 = vmatpush1.bf16.msra.mxu0 %v3373_v54  ;;  %v887_v53 = vld [vmem:[#allocation5 + $0xb8] sm:$0xff]  ;;  %v3175_v54 = vcombine.low %v874_v43, %v878_v45  ;;  %v930_v43 = vld [vmem:[#allocation5 + $0x210] sm:$0xff] }
 0x2d6   : > { %2507 = vmatprep.subr.bf16.mxu1 %v3380_v55  ;;  %2593 = vmatprep.subr.bf16.mxu0 %v3382_v56  ;;  %v3177_v55 = vcombine.low %v875_v46, %v879_v47  ;;  %v3184_v56 = vcombine.high %v882_v50, %v886_v51  ;;  %v3186_v57 = vcombine.high %v883_v52, %v887_v53  ;;  %v934_v45 = vld [vmem:[#allocation5 + $0x230] sm:$0xff]  ;;  %v931_v46 = vld [vmem:[#allocation5 + $0x218] sm:$0xff] }
 0x2d7   : > { %v935_v47 = vld [vmem:[#allocation5 + $0x238] sm:$0xff] }
 0x2d9   : > { %2508 = vmatpush1.bf16.msra.mxu1 %v3379_v61  ;;  %2594 = vmatpush1.bf16.msra.mxu0 %v3381_v62  ;;  %v895_v61 = vld [vmem:[#allocation5 + $0xf8] sm:$0xff]  ;;  %v3183_v62 = vcombine.low %v882_v50, %v886_v51  ;;  %v938_v50 = vld [vmem:[#allocation5 + $0x250] sm:$0xff] }
 0x2da   : > { %2509 = vmatprep.subr.bf16.mxu1 %v3388_v63  ;;  %2595 = vmatprep.subr.bf16.mxu0 %v3390_v0  ;;  %v3185_v63 = vcombine.low %v883_v52, %v887_v53  ;;  %v3192_v0 = vcombine.high %v890_v58, %v894_v59  ;;  %v3194_v2 = vcombine.high %v891_v60, %v895_v61  ;;  %v942_v51 = vld [vmem:[#allocation5 + $0x270] sm:$0xff]  ;;  %v939_v52 = vld [vmem:[#allocation5 + $0x258] sm:$0xff] }
 0x2db   : > { %v943_v53 = vld [vmem:[#allocation5 + $0x278] sm:$0xff] }
 0x2dd   : > { %2510 = vmatpush1.bf16.msra.mxu1 %v3387_v5  ;;  %2596 = vmatpush1.bf16.msra.mxu0 %v3389_v6  ;;  %v3191_v5 = vcombine.low %v890_v58, %v894_v59  ;;  %v3193_v6 = vcombine.low %v891_v60, %v895_v61  ;;  %v946_v58 = vld [vmem:[#allocation5 + $0x290] sm:$0xff]  ;;  %v947_v60 = vld [vmem:[#allocation5 + $0x298] sm:$0xff] }
 0x2de   : > { %2511 = vmatprep.subr.bf16.mxu1 %v3396_v7  ;;  %2597 = vmatprep.subr.bf16.mxu0 %v3398_v8  ;;  %v3200_v7 = vcombine.high %v898_v3, %v902_v1  ;;  %v950_v59 = vld [vmem:[#allocation5 + $0x2b0] sm:$0xff]  ;;  %v951_v61 = vld [vmem:[#allocation5 + $0x2b8] sm:$0xff] }
 0x2e1   : > { %2512 = vmatpush1.bf16.msra.mxu1 %v3395_v13  ;;  %2598 = vmatpush1.bf16.msra.mxu0 %v3397_v14  ;;  %v3199_v13 = vcombine.low %v898_v3, %v902_v1  ;;  %v954_v3 = vld [vmem:[#allocation5 + $0x2d0] sm:$0xff] }
 0x2e2   : > { %2513 = vmatprep.subr.bf16.mxu1 %v3404_v15  ;;  %2599 = vmatprep.subr.bf16.mxu0 %v3406_v16  ;;  %v3208_v15 = vcombine.high %v906_v9, %v910_v10  ;;  %v3210_v16 = vcombine.high %v907_v11, %v911_v12  ;;  %v958_v1 = vld [vmem:[#allocation5 + $0x2f0] sm:$0xff] }
 0x2e5   : > { %2514 = vmatpush1.bf16.msra.mxu1 %v3403_v28  ;;  %2600 = vmatpush1.bf16.msra.mxu0 %v3405_v30  ;;  %v3207_v28 = vcombine.low %v906_v9, %v910_v10  ;;  %v3209_v30 = vcombine.low %v907_v11, %v911_v12  ;;  %v962_v9 = vld [vmem:[#allocation5 + $0x310] sm:$0xff]  ;;  %v963_v11 = vld [vmem:[#allocation5 + $0x318] sm:$0xff] }
 0x2e6   : > { %2515 = vmatprep.subr.bf16.mxu1 %v3412_v31  ;;  %2601 = vmatprep.subr.bf16.mxu0 %v3414_v32  ;;  %v3216_v31 = vcombine.high %v914_v17, %v918_v20  ;;  %v3218_v32 = vcombine.high %v915_v21, %v919_v22  ;;  %v966_v10 = vld [vmem:[#allocation5 + $0x330] sm:$0xff]  ;;  %v967_v12 = vld [vmem:[#allocation5 + $0x338] sm:$0xff] }
 0x2e9   : > { %2516 = vmatpush1.bf16.msra.mxu1 %v3411_v37  ;;  %2602 = vmatpush1.bf16.msra.mxu0 %v3413_v38  ;;  %v3215_v37 = vcombine.low %v914_v17, %v918_v20  ;;  %v3217_v38 = vcombine.low %v915_v21, %v919_v22  ;;  %v970_v17 = vld [vmem:[#allocation5 + $0x350] sm:$0xff]  ;;  %v971_v21 = vld [vmem:[#allocation5 + $0x358] sm:$0xff] }
 0x2ea   : > { %2614 = vmatprep.subr.bf16.mxu1 %v3168_v39  ;;  %2700 = vmatprep.subr.bf16.mxu0 %v3170_v42  ;;  %v3224_v39 = vcombine.high %v922_v33, %v926_v34  ;;  %v3226_v42 = vcombine.high %v923_v35, %v927_v36  ;;  %v974_v20 = vld [vmem:[#allocation5 + $0x370] sm:$0xff]  ;;  %v975_v22 = vld [vmem:[#allocation5 + $0x378] sm:$0xff] }
 0x2ec   : > { %2518 = vmatmul.mubr.bf16.vlgmr.msra.gmra.mrb[4].mxu1 %v4024_v19  ;;  %2604 = vmatmul.mubr.bf16.vlgmr.msra.gmra.mrb[8].mxu0 %v4024_v19 }
 0x2ed   : > { %2615 = vmatpush1.bf16.msra.mxu1 %v3167_v40  ;;  %2646 = vmatprep.mubr.bf16.mxu1 %v4026_v26  ;;  %v3223_v40 = vcombine.low %v922_v33, %v926_v34  ;;  %v978_v33 = vld [vmem:[#allocation5 + $0x390] sm:$0xff] }
 0x2ee   : > { %2701 = vmatpush1.bf16.msra.mxu0 %v3169_v41  ;;  %2732 = vmatprep.mubr.bf16.mxu0 %v4026_v26  ;;  %v899_v26 = vld [vmem:[#allocation5 + $0x118] sm:$0xff]  ;;  %v3225_v41 = vcombine.low %v923_v35, %v927_v36  ;;  %v982_v34 = vld [vmem:[#allocation5 + $0x3b0] sm:$0xff] }
 0x2ef   : > { %2616 = vmatprep.subr.bf16.mxu1 %v3176_v48  ;;  %2702 = vmatprep.subr.bf16.mxu0 %v3178_v49  ;;  %v3202_v8 = vcombine.high %v899_v26, %v903_v4  ;;  %v3201_v14 = vcombine.low %v899_v26, %v903_v4  ;;  %v3232_v48 = vcombine.high %v930_v43, %v934_v45  ;;  %v955_v26 = vld [vmem:[#allocation5 + $0x2d8] sm:$0xff] }
 0x2f0   : > { %v3234_v49 = vcombine.high %v931_v46, %v935_v47  ;;  %v959_v4 = vld [vmem:[#allocation5 + $0x2f8] sm:$0xff] }
 0x2f1   : > { %2617 = vmatpush1.bf16.msra.mxu1 %v3175_v54  ;;  %v3231_v54 = vcombine.low %v930_v43, %v934_v45  ;;  %v979_v35 = vld [vmem:[#allocation5 + $0x398] sm:$0xff]  ;;  %v986_v43 = vld [vmem:[#allocation5 + $0x3d0] sm:$0xff] }
 0x2f2   : > { %2703 = vmatpush1.bf16.msra.mxu0 %v3177_v55  ;;  %2618 = vmatprep.subr.bf16.mxu1 %v3184_v56  ;;  %v3233_v55 = vcombine.low %v931_v46, %v935_v47  ;;  %v3240_v56 = vcombine.high %v938_v50, %v942_v51  ;;  %v983_v36 = vld [vmem:[#allocation5 + $0x3b8] sm:$0xff]  ;;  %v990_v45 = vld [vmem:[#allocation5 + $0x3f0] sm:$0xff] }
 0x2f3   : > { %2704 = vmatprep.subr.bf16.mxu0 %v3186_v57  ;;  %v3242_v57 = vcombine.high %v939_v52, %v943_v53  ;;  %v987_v46 = vld [vmem:[#allocation5 + $0x3d8] sm:$0xff] }
 0x2f4   : > { %v991_v47 = vld [vmem:[#allocation5 + $0x3f8] sm:$0xff] }
 0x2f5   : > { %2619 = vmatpush1.bf16.msra.mxu1 %v3183_v62  ;;  %v3239_v62 = vcombine.low %v938_v50, %v942_v51  ;;  %v994_v50 = vld [vmem:[#allocation5 + $0x410] sm:$0xff] }
 0x2f6   : > { %2705 = vmatpush1.bf16.msra.mxu0 %v3185_v63  ;;  %2620 = vmatprep.subr.bf16.mxu1 %v3192_v0  ;;  %v3241_v63 = vcombine.low %v939_v52, %v943_v53  ;;  %v3248_v0 = vcombine.high %v946_v58, %v950_v59  ;;  %v998_v51 = vld [vmem:[#allocation5 + $0x430] sm:$0xff]  ;;  %v995_v52 = vld [vmem:[#allocation5 + $0x418] sm:$0xff] }
 0x2f7   : > { %2706 = vmatprep.subr.bf16.mxu0 %v3194_v2  ;;  %v3250_v2 = vcombine.high %v947_v60, %v951_v61  ;;  %v999_v53 = vld [vmem:[#allocation5 + $0x438] sm:$0xff] }
 0x2f9   : > { %2621 = vmatpush1.bf16.msra.mxu1 %v3191_v5  ;;  %v3247_v5 = vcombine.low %v946_v58, %v950_v59  ;;  %v1002_v58 = vld [vmem:[#allocation5 + $0x450] sm:$0xff] }
 0x2fa   : > { %2707 = vmatpush1.bf16.msra.mxu0 %v3193_v6  ;;  %2622 = vmatprep.subr.bf16.mxu1 %v3200_v7  ;;  %v3249_v6 = vcombine.low %v947_v60, %v951_v61  ;;  %v3256_v7 = vcombine.high %v954_v3, %v958_v1  ;;  %v1006_v59 = vld [vmem:[#allocation5 + $0x470] sm:$0xff]  ;;  %v3295_v60 = vcombine.low %v994_v50, %v998_v51  ;;  %v1003_v61 = vld [vmem:[#allocation5 + $0x458] sm:$0xff] }
 0x2fb   : > { %2708 = vmatprep.subr.bf16.mxu0 %v3202_v8  ;;  %v3258_v8 = vcombine.high %v955_v26, %v959_v4 }
 0x2fd   : > { %2623 = vmatpush1.bf16.msra.mxu1 %v3199_v13  ;;  %v3255_v13 = vcombine.low %v954_v3, %v958_v1  ;;  %v1014_v3 = vld [vmem:[#allocation5 + $0x4b0] sm:$0xff] }
 0x2fe   : > { %2709 = vmatpush1.bf16.msra.mxu0 %v3201_v14  ;;  %2624 = vmatprep.subr.bf16.mxu1 %v3208_v15  ;;  %v3257_v14 = vcombine.low %v955_v26, %v959_v4  ;;  %v3264_v15 = vcombine.high %v962_v9, %v966_v10  ;;  %v1011_v26 = vld [vmem:[#allocation5 + $0x498] sm:$0xff] }
 0x2ff   : > { %2710 = vmatprep.subr.bf16.mxu0 %v3210_v16  ;;  %v3266_v16 = vcombine.high %v963_v11, %v967_v12  ;;  %v1015_v4 = vld [vmem:[#allocation5 + $0x4b8] sm:$0xff] }
 0x301   : > { %2625 = vmatpush1.bf16.msra.mxu1 %v3207_v28  ;;  %v3263_v28 = vcombine.low %v962_v9, %v966_v10  ;;  %v1018_v9 = vld [vmem:[#allocation5 + $0x4d0] sm:$0xff] }
 0x302   : > { %2711 = vmatpush1.bf16.msra.mxu0 %v3209_v30  ;;  %2626 = vmatprep.subr.bf16.mxu1 %v3216_v31  ;;  %v3265_v30 = vcombine.low %v963_v11, %v967_v12  ;;  %v3272_v31 = vcombine.high %v970_v17, %v974_v20  ;;  %v1022_v10 = vld [vmem:[#allocation5 + $0x4f0] sm:$0xff]  ;;  %v1019_v11 = vld [vmem:[#allocation5 + $0x4d8] sm:$0xff] }
 0x303   : > { %2712 = vmatprep.subr.bf16.mxu0 %v3218_v32  ;;  %v3274_v32 = vcombine.high %v971_v21, %v975_v22  ;;  %v1023_v12 = vld [vmem:[#allocation5 + $0x4f8] sm:$0xff] }
 0x305   : > { %2627 = vmatpush1.bf16.msra.mxu1 %v3215_v37  ;;  %v3271_v37 = vcombine.low %v970_v17, %v974_v20  ;;  %v1030_v17 = vld [vmem:[#allocation5 + $0x530] sm:$0xff]  ;;  %v1027_v20 = vld [vmem:[#allocation5 + $0x518] sm:$0xff] }
 0x306   : > { %2713 = vmatpush1.bf16.msra.mxu0 %v3217_v38  ;;  %2628 = vmatprep.subr.bf16.mxu1 %v3224_v39  ;;  %v3273_v38 = vcombine.low %v971_v21, %v975_v22  ;;  %v3280_v39 = vcombine.high %v978_v33, %v982_v34  ;;  %v1031_v21 = vld [vmem:[#allocation5 + $0x538] sm:$0xff]  ;;  %v3321_v22 = vcombine.low %v1019_v11, %v1023_v12 }
 0x307   : > { %2714 = vmatprep.subr.bf16.mxu0 %v3226_v42  ;;  %v3282_v42 = vcombine.high %v979_v35, %v983_v36 }
 0x309   : > { %2629 = vmatpush1.bf16.msra.mxu1 %v3223_v40  ;;  %v3279_v40 = vcombine.low %v978_v33, %v982_v34  ;;  %v1035_v33 = vld [vmem:[#allocation5 + $0x558] sm:$0xff] }
 0x30a   : > { %2715 = vmatpush1.bf16.msra.mxu0 %v3225_v41  ;;  %2630 = vmatprep.subr.bf16.mxu1 %v3232_v48  ;;  %v3281_v41 = vcombine.low %v979_v35, %v983_v36  ;;  %v3288_v48 = vcombine.high %v986_v43, %v990_v45  ;;  %v1039_v34 = vld [vmem:[#allocation5 + $0x578] sm:$0xff]  ;;  %v3329_v36 = vcombine.low %v1027_v20, %v1031_v21 }
 0x30b   : > { %2716 = vmatprep.subr.bf16.mxu0 %v3234_v49  ;;  %v3290_v49 = vcombine.high %v987_v46, %v991_v47 }
 0x30d   : > { %2631 = vmatpush1.bf16.msra.mxu1 %v3231_v54  ;;  %v3287_v54 = vcombine.low %v986_v43, %v990_v45  ;;  %v1043_v43 = vld [vmem:[#allocation5 + $0x598] sm:$0xff] }
 0x30e   : > { %2717 = vmatpush1.bf16.msra.mxu0 %v3233_v55  ;;  %2632 = vmatprep.subr.bf16.mxu1 %v3240_v56  ;;  %v3289_v55 = vcombine.low %v987_v46, %v991_v47  ;;  %v3296_v56 = vcombine.high %v994_v50, %v998_v51  ;;  %v1047_v45 = vld [vmem:[#allocation5 + $0x5b8] sm:$0xff]  ;;  %v3337_v47 = vcombine.low %v1035_v33, %v1039_v34 }
 0x30f   : > { %2718 = vmatprep.subr.bf16.mxu0 %v3242_v57  ;;  %v3298_v57 = vcombine.high %v995_v52, %v999_v53  ;;  %v1051_v50 = vld [vmem:[#allocation5 + $0x5d8] sm:$0xff] }
 0x310   : > { %v1055_v51 = vld [vmem:[#allocation5 + $0x5f8] sm:$0xff] }
 0x311   : > { %2633 = vmatpush1.bf16.msra.mxu1 %v3239_v62  ;;  %v1007_v62 = vld [vmem:[#allocation5 + $0x478] sm:$0xff] }
 0x312   : > { %2719 = vmatpush1.bf16.msra.mxu0 %v3241_v63  ;;  %2634 = vmatprep.subr.bf16.mxu1 %v3248_v0  ;;  %v3297_v63 = vcombine.low %v995_v52, %v999_v53  ;;  %v3304_v0 = vcombine.high %v1002_v58, %v1006_v59  ;;  %v3306_v1 = vcombine.high %v1003_v61, %v1007_v62 }
 0x313   : > { %2720 = vmatprep.subr.bf16.mxu0 %v3250_v2  ;;  %v1010_v2 = vld [vmem:[#allocation5 + $0x490] sm:$0xff]  ;;  %v3345_v53 = vcombine.low %v1043_v43, %v1047_v45 }
 0x315   : > { %2635 = vmatpush1.bf16.msra.mxu1 %v3247_v5  ;;  %v3303_v5 = vcombine.low %v1002_v58, %v1006_v59  ;;  %v1059_v58 = vld [vmem:[#allocation5 + $0x618] sm:$0xff] }
 0x316   : > { %2721 = vmatpush1.bf16.msra.mxu0 %v3249_v6  ;;  %2636 = vmatprep.subr.bf16.mxu1 %v3256_v7  ;;  %v3305_v6 = vcombine.low %v1003_v61, %v1007_v62  ;;  %v3312_v7 = vcombine.high %v1010_v2, %v1014_v3  ;;  %v1063_v59 = vld [vmem:[#allocation5 + $0x638] sm:$0xff]  ;;  %v3353_v61 = vcombine.low %v1051_v50, %v1055_v51 }
 0x317   : > { %2722 = vmatprep.subr.bf16.mxu0 %v3258_v8  ;;  %v3314_v8 = vcombine.high %v1011_v26, %v1015_v4 }
 0x319   : > { %2637 = vmatpush1.bf16.msra.mxu1 %v3255_v13  ;;  %v3311_v13 = vcombine.low %v1010_v2, %v1014_v3  ;;  %v1070_v2 = vld [vmem:[#allocation5 + $0x670] sm:$0xff]  ;;  %v1067_v3 = vld [vmem:[#allocation5 + $0x658] sm:$0xff] }
 0x31a   : > { %2723 = vmatpush1.bf16.msra.mxu0 %v3257_v14  ;;  %2638 = vmatprep.subr.bf16.mxu1 %v3264_v15  ;;  %v3320_v14 = vcombine.high %v1018_v9, %v1022_v10  ;;  %v3322_v15 = vcombine.high %v1019_v11, %v1023_v12 }
 0x31b   : > { %2724 = vmatprep.subr.bf16.mxu0 %v3266_v16  ;;  %v1026_v16 = vld [vmem:[#allocation5 + $0x510] sm:$0xff] }
 0x31c   : > { %v3327_v35 = vcombine.low %v1026_v16, %v1030_v17 }
 0x31d   : > { %2639 = vmatpush1.bf16.msra.mxu1 %v3263_v28  ;;  %v3328_v28 = vcombine.high %v1026_v16, %v1030_v17  ;;  %v1083_v16 = vld [vmem:[#allocation5 + $0x6d8] sm:$0xff] }
 0x31e   : > { %2725 = vmatpush1.bf16.msra.mxu0 %v3265_v30  ;;  %2640 = vmatprep.subr.bf16.mxu1 %v3272_v31  ;;  %v3330_v30 = vcombine.high %v1027_v20, %v1031_v21  ;;  %v1034_v31 = vld [vmem:[#allocation5 + $0x550] sm:$0xff]  ;;  %v1087_v17 = vld [vmem:[#allocation5 + $0x6f8] sm:$0xff] }
 0x31f   : > { %2726 = vmatprep.subr.bf16.mxu0 %v3274_v32  ;;  %v1038_v32 = vld [vmem:[#allocation5 + $0x570] sm:$0xff] }
 0x320   : > { %v3335_v46 = vcombine.low %v1034_v31, %v1038_v32 }
 0x321   : > { %2641 = vmatpush1.bf16.msra.mxu1 %v3271_v37  ;;  %v3336_v37 = vcombine.high %v1034_v31, %v1038_v32  ;;  %v1091_v31 = vld [vmem:[#allocation5 + $0x718] sm:$0xff] }
 0x322   : > { %2727 = vmatpush1.bf16.msra.mxu0 %v3273_v38  ;;  %2642 = vmatprep.subr.bf16.mxu1 %v3280_v39  ;;  %v3338_v38 = vcombine.high %v1035_v33, %v1039_v34  ;;  %v1042_v39 = vld [vmem:[#allocation5 + $0x590] sm:$0xff]  ;;  %v1095_v32 = vld [vmem:[#allocation5 + $0x738] sm:$0xff]  ;;  %v3385_v34 = vcombine.low %v1083_v16, %v1087_v17 }
 0x323   : > { %2728 = vmatprep.subr.bf16.mxu0 %v3282_v42  ;;  %v1046_v42 = vld [vmem:[#allocation5 + $0x5b0] sm:$0xff] }
 0x324   : > { %v3343_v52 = vcombine.low %v1042_v39, %v1046_v42 }
 0x325   : > { %2643 = vmatpush1.bf16.msra.mxu1 %v3279_v40  ;;  %v3344_v40 = vcombine.high %v1042_v39, %v1046_v42  ;;  %v1099_v39 = vld [vmem:[#allocation5 + $0x758] sm:$0xff] }
 0x326   : > { %2729 = vmatpush1.bf16.msra.mxu0 %v3281_v41  ;;  %2644 = vmatprep.subr.bf16.mxu1 %v3288_v48  ;;  %v3346_v41 = vcombine.high %v1043_v43, %v1047_v45  ;;  %v1050_v48 = vld [vmem:[#allocation5 + $0x5d0] sm:$0xff]  ;;  %v1103_v42 = vld [vmem:[#allocation5 + $0x778] sm:$0xff]  ;;  %v3393_v45 = vcombine.low %v1091_v31, %v1095_v32 }
 0x327   : > { %2730 = vmatprep.subr.bf16.mxu0 %v3290_v49  ;;  %v1054_v49 = vld [vmem:[#allocation5 + $0x5f0] sm:$0xff] }
 0x329   : > { %2645 = vmatpush1.bf16.msra.mxu1 %v3287_v54  ;;  %v3352_v54 = vcombine.high %v1050_v48, %v1054_v49 }
 0x32a   : > { %2731 = vmatpush1.bf16.msra.mxu0 %v3289_v55  ;;  %2657 = vmatprep.subr.bf16.mxu1 %v3296_v56  ;;  %v3354_v55 = vcombine.high %v1051_v50, %v1055_v51  ;;  %v1058_v56 = vld [vmem:[#allocation5 + $0x610] sm:$0xff]  ;;  %v3401_v51 = vcombine.low %v1099_v39, %v1103_v42 }
 0x32b   : > { %2743 = vmatprep.subr.bf16.mxu0 %v3298_v57  ;;  %v1062_v57 = vld [vmem:[#allocation5 + $0x630] sm:$0xff] }
 0x32c   : > { %2647 = vmatmul.mubr.bf16.vlgmr.msra.gmra.mrb[8].mxu1 %v4022_v18  ;;  %v3360_v62 = vcombine.high %v1058_v56, %v1062_v57 }
 0x32d   : > { %2733 = vmatmul.mubr.bf16.vlgmr.msra.gmra.mrb[12].mxu0 %v4022_v18  ;;  %2658 = vmatpush1.bf16.msra.mxu1 %v3295_v60  ;;  %v3313_v18 = vcombine.low %v1011_v26, %v1015_v4  ;;  %v3351_v60 = vcombine.low %v1050_v48, %v1054_v49  ;;  %v3359_v26 = vcombine.low %v1058_v56, %v1062_v57  ;;  %v1107_v48 = vld [vmem:[#allocation5 + $0x798] sm:$0xff] }
 0x32e   : > { %2689 = vmatprep.mubr.bf16.mxu1 %v4028_v27  ;;  %2744 = vmatpush1.bf16.msra.mxu0 %v3297_v63  ;;  %v3362_v63 = vcombine.high %v1059_v58, %v1063_v59  ;;  %v3361_v4 = vcombine.low %v1059_v58, %v1063_v59  ;;  %v1111_v49 = vld [vmem:[#allocation5 + $0x7b8] sm:$0xff] }
 0x32f   : > { %2775 = vmatprep.mubr.bf16.mxu0 %v4028_v27  ;;  %2659 = vmatprep.subr.bf16.mxu1 %v3304_v0  ;;  %v3319_v27 = vcombine.low %v1018_v9, %v1022_v10  ;;  %v1066_v0 = vld [vmem:[#allocation5 + $0x650] sm:$0xff]  ;;  %v1075_v9 = vld [vmem:[#allocation5 + $0x698] sm:$0xff]  ;;  %v3409_v59 = vcombine.low %v1107_v48, %v1111_v49 }
 0x330   : > { %2745 = vmatprep.subr.bf16.mxu0 %v3306_v1  ;;  %v1071_v1 = vld [vmem:[#allocation5 + $0x678] sm:$0xff]  ;;  %v3367_v11 = vcombine.low %v1066_v0, %v1070_v2 }
 0x331   : > { %2660 = vmatpush1.bf16.msra.mxu1 %v3303_v5  ;;  %v3368_v5 = vcombine.high %v1066_v0, %v1070_v2  ;;  %v1079_v10 = vld [vmem:[#allocation5 + $0x6b8] sm:$0xff]  ;;  %v3369_v12 = vcombine.low %v1067_v3, %v1071_v1  ;;  %v4049_v0 = vld [vmem:[%s4146_s8] sm:$0xff] }
 0x332   : > { %2746 = vmatpush1.bf16.msra.mxu0 %v3305_v6  ;;  %2661 = vmatprep.subr.bf16.mxu1 %v3312_v7  ;;  %v3370_v6 = vcombine.high %v1067_v3, %v1071_v1  ;;  %v1074_v7 = vld [vmem:[#allocation5 + $0x690] sm:$0xff]  ;;  %v3377_v21 = vcombine.low %v1075_v9, %v1079_v10  ;;  %v1115_v56 = vld [vmem:[#allocation5 + $0x7d8] sm:$0xff]  ;;  %v1125_v2 = vrot.slane %v4049_v0, %v3979_v25 }
 0x333   : > { %2747 = vmatprep.subr.bf16.mxu0 %v3314_v8  ;;  %v1078_v8 = vld [vmem:[#allocation5 + $0x6b0] sm:$0xff]  ;;  %v1119_v57 = vld [vmem:[#allocation5 + $0x7f8] sm:$0xff]  ;;  %v1133_v3 = vrot.slane %v4049_v0, %v3985_v29  ;;  %v1129_v1 = vrot.slane %v4049_v0, %v3976_v24 }
 0x334   : > { %v3375_v20 = vcombine.low %v1074_v7, %v1078_v8 }
 0x335   : > { %2662 = vmatpush1.bf16.msra.mxu1 %v3311_v13  ;;  %v3376_v13 = vcombine.high %v1074_v7, %v1078_v8 }
 0x336   : > { %2748 = vmatpush1.bf16.msra.mxu0 %v3313_v18  ;;  %2663 = vmatprep.subr.bf16.mxu1 %v3320_v14  ;;  %v3378_v18 = vcombine.high %v1075_v9, %v1079_v10  ;;  %v1082_v14 = vld [vmem:[#allocation5 + $0x6d0] sm:$0xff] }
 0x337   : > { %2749 = vmatprep.subr.bf16.mxu0 %v3322_v15  ;;  %v1086_v15 = vld [vmem:[#allocation5 + $0x6f0] sm:$0xff] }
 0x338   : > { %v3383_v33 = vcombine.low %v1082_v14, %v1086_v15 }
 0x339   : > { %2664 = vmatpush1.bf16.msra.mxu1 %v3319_v27  ;;  %v3384_v27 = vcombine.high %v1082_v14, %v1086_v15 }
 0x33a   : > { %2750 = vmatpush1.bf16.msra.mxu0 %v3321_v22  ;;  %2665 = vmatprep.subr.bf16.mxu1 %v3328_v28  ;;  %v3386_v22 = vcombine.high %v1083_v16, %v1087_v17  ;;  %v1090_v28 = vld [vmem:[#allocation5 + $0x710] sm:$0xff] }
 0x33b   : > { %2751 = vmatprep.subr.bf16.mxu0 %v3330_v30  ;;  %v1094_v30 = vld [vmem:[#allocation5 + $0x730] sm:$0xff] }
 0x33c   : > { %v3391_v43 = vcombine.low %v1090_v28, %v1094_v30 }
 0x33d   : > { %2666 = vmatpush1.bf16.msra.mxu1 %v3327_v35  ;;  %v3392_v35 = vcombine.high %v1090_v28, %v1094_v30 }
 0x33e   : > { %2752 = vmatpush1.bf16.msra.mxu0 %v3329_v36  ;;  %2667 = vmatprep.subr.bf16.mxu1 %v3336_v37  ;;  %v3394_v36 = vcombine.high %v1091_v31, %v1095_v32  ;;  %v1098_v37 = vld [vmem:[#allocation5 + $0x750] sm:$0xff] }
 0x33f   : > { %2753 = vmatprep.subr.bf16.mxu0 %v3338_v38  ;;  %v1102_v38 = vld [vmem:[#allocation5 + $0x770] sm:$0xff] }
 0x340   : > { %v3399_v50 = vcombine.low %v1098_v37, %v1102_v38 }
 0x341   : > { %2668 = vmatpush1.bf16.msra.mxu1 %v3335_v46  ;;  %v3400_v46 = vcombine.high %v1098_v37, %v1102_v38 }
 0x342   : > { %2754 = vmatpush1.bf16.msra.mxu0 %v3337_v47  ;;  %2669 = vmatprep.subr.bf16.mxu1 %v3344_v40  ;;  %v3402_v47 = vcombine.high %v1099_v39, %v1103_v42  ;;  %v1106_v40 = vld [vmem:[#allocation5 + $0x790] sm:$0xff] }
 0x343   : > { %2755 = vmatprep.subr.bf16.mxu0 %v3346_v41  ;;  %v1110_v41 = vld [vmem:[#allocation5 + $0x7b0] sm:$0xff] }
 0x344   : > { %v3407_v58 = vcombine.low %v1106_v40, %v1110_v41 }
 0x345   : > { %2670 = vmatpush1.bf16.msra.mxu1 %v3343_v52  ;;  %v3408_v52 = vcombine.high %v1106_v40, %v1110_v41 }
 0x346   : > { %2756 = vmatpush1.bf16.msra.mxu0 %v3345_v53  ;;  %2671 = vmatprep.subr.bf16.mxu1 %v3352_v54  ;;  %v3410_v53 = vcombine.high %v1107_v48, %v1111_v49  ;;  %v1114_v54 = vld [vmem:[#allocation5 + $0x7d0] sm:$0xff]  ;;  %v3772_v49 = vmov 1966171168  }
 0x347   : > { %2757 = vmatprep.subr.bf16.mxu0 %v3354_v55  ;;  %v1118_v55 = vld [vmem:[#allocation5 + $0x7f0] sm:$0xff] }
 0x349   : > { %2672 = vmatpush1.bf16.msra.mxu1 %v3351_v60  ;;  %v3416_v60 = vcombine.high %v1114_v54, %v1118_v55 }
 0x34a   : > { %2758 = vmatpush1.bf16.msra.mxu0 %v3353_v61  ;;  %2673 = vmatprep.subr.bf16.mxu1 %v3360_v62  ;;  %v3418_v61 = vcombine.high %v1115_v56, %v1119_v57  ;;  %v3415_v62 = vcombine.low %v1114_v54, %v1118_v55 }
 0x34b   : > { %2759 = vmatprep.subr.bf16.mxu0 %v3362_v63  ;;  %v3417_v63 = vcombine.low %v1115_v56, %v1119_v57 }
 0x34d   : > { %2674 = vmatpush1.bf16.msra.mxu1 %v3359_v26  ;;  %v1137_v26 = vrot.slane %v4049_v0, %v592_v44 }
 0x34e   : > { %2760 = vmatpush1.bf16.msra.mxu0 %v3361_v4  ;;  %2675 = vmatprep.subr.bf16.mxu1 %v3368_v5 }
 0x34f   : > { %2761 = vmatprep.subr.bf16.mxu0 %v3370_v6 }
 0x351   : > { %2676 = vmatpush1.bf16.msra.mxu1 %v3367_v11 }
 0x352   : > { %2762 = vmatpush1.bf16.msra.mxu0 %v3369_v12  ;;  %2677 = vmatprep.subr.bf16.mxu1 %v3376_v13 }
 0x353   : > { %2763 = vmatprep.subr.bf16.mxu0 %v3378_v18 }
 0x355   : > { %2678 = vmatpush1.bf16.msra.mxu1 %v3375_v20 }
 0x356   : > { %2764 = vmatpush1.bf16.msra.mxu0 %v3377_v21  ;;  %2679 = vmatprep.subr.bf16.mxu1 %v3384_v27 }
 0x357   : > { %2765 = vmatprep.subr.bf16.mxu0 %v3386_v22 }
 0x359   : > { %2680 = vmatpush1.bf16.msra.mxu1 %v3383_v33 }
 0x35a   : > { %2766 = vmatpush1.bf16.msra.mxu0 %v3385_v34  ;;  %2681 = vmatprep.subr.bf16.mxu1 %v3392_v35 }
 0x35b   : > { %2767 = vmatprep.subr.bf16.mxu0 %v3394_v36 }
 0x35d   : > { %2682 = vmatpush1.bf16.msra.mxu1 %v3391_v43 }
 0x35e   : > { %2768 = vmatpush1.bf16.msra.mxu0 %v3393_v45  ;;  %2683 = vmatprep.subr.bf16.mxu1 %v3400_v46 }
 0x35f   : > { %2769 = vmatprep.subr.bf16.mxu0 %v3402_v47 }
 0x361   : > { %2684 = vmatpush1.bf16.msra.mxu1 %v3399_v50  ;;  %v2891_v50 = vunpack.c.l.s4 %v3772_v49 }
 0x362   : > { %2770 = vmatpush1.bf16.msra.mxu0 %v3401_v51  ;;  %2685 = vmatprep.subr.bf16.mxu1 %v3408_v52 }
 0x363   : > { %2771 = vmatprep.subr.bf16.mxu0 %v3410_v53 }
 0x365   : > { %2686 = vmatpush1.bf16.msra.mxu1 %v3407_v58 }
 0x366   : > { %2772 = vmatpush1.bf16.msra.mxu0 %v3409_v59  ;;  %2687 = vmatprep.subr.bf16.mxu1 %v3416_v60  ;;  %v2892_v59 = vunpack.c.0.s8 %v2891_v50 }
 0x367   : > { %2773 = vmatprep.subr.bf16.mxu0 %v3418_v61 }
 0x369   : > { %2688 = vmatpush1.bf16.msra.mxu1 %v3415_v62 }
 0x36a   : > { %2774 = vmatpush1.bf16.msra.mxu0 %v3417_v63 }
 0x36c   : > { %2690 = vmatmul.mubr.bf16.vlgmr.msra.gmra.mrb[8].mxu1 %v4024_v19 }
 0x36d   : > { %2776 = vmatmul.mubr.bf16.vlgmr.msra.gmra.mrb[12].mxu0 %v4024_v19 }
 0x3bf   : > { %v2519_v4 = vpop.f32.mrb[4].mxu1  ;;  %v2605_v19 = vpop.f32.mrb[8].mxu0 }
 0x3c0   : > { %v3443_v5 = vadd.f32 %v2519_v4, %v1125_v2  ;;  %v3447_v6 = vadd.f32 %v2605_v19, %v1133_v3  ;;  %v2521_v7 = vpop.f32.mrb[5].mxu1  ;;  %v2607_v8 = vpop.f32.mrb[9].mxu0  ;;  %v4061_v4 = vsub.s32 %v2892_v59, %v3973_v23 }
 0x3c1   : > { %v3444_v9 = vadd.f32 %v2521_v7, %v1129_v1  ;;  %v3448_v10 = vadd.f32 %v2607_v8, %v1137_v26  ;;  %v2523_v11 = vpop.f32.mrb[6].mxu1  ;;  %v2609_v25 = vpop.f32.mrb[10].mxu0 }
 0x3c2   : > { %v2786_v12 = vmul.f32 0.01, %v3443_v5  ;;  %v2788_v13 = vmul.f32 0.01, %v3447_v6  ;;  %v3445_v29 = vadd.f32 %v2523_v11, %v1125_v2  ;;  %v3449_v18 = vadd.f32 %v2609_v25, %v1133_v3  ;;  %v2525_v14 = vpop.f32.mrb[7].mxu1  ;;  %v2611_v24 = vpop.f32.mrb[11].mxu0 }
 0x3c3   : > { %v2787_v15 = vmul.f32 0.01, %v3444_v9  ;;  %v2789_v16 = vmul.f32 0.01, %v3448_v10  ;;  %v3446_v17 = vadd.f32 %v2525_v14, %v1129_v1  ;;  %v3450_v44 = vadd.f32 %v2611_v24, %v1137_v26 }
 0x3c4   : > { %v2794_v20 = vmul.f32 0.01, %v3445_v29  ;;  %v2796_v21 = vmul.f32 0.01, %v3449_v18  ;;  %v2802_v28 = vmax.f32 %v3443_v5, %v2786_v12  ;;  %v2804_v30 = vmax.f32 %v3447_v6, %v2788_v13 }
 0x3c5   : > { %v2795_v27 = vmul.f32 0.01, %v3446_v17  ;;  %v2797_v22 = vmul.f32 0.01, %v3450_v44  ;;  %v2803_v33 = vmax.f32 %v3444_v9, %v2787_v15  ;;  %v2805_v34 = vmax.f32 %v3448_v10, %v2789_v16 }
 0x3c6   : > { %v2810_v31 = vmax.f32 %v3445_v29, %v2794_v20  ;;  %v2812_v32 = vmax.f32 %v3449_v18, %v2796_v21  ;;  %v1140_v10 = vsub.s32 4, %v3973_v23  ;;  %v1148_v11 = vsub.s32 6, %v3973_v23 }
 0x3c7   : > { %v2811_v35 = vmax.f32 %v3446_v17, %v2795_v27  ;;  %v2813_v36 = vmax.f32 %v3450_v44, %v2797_v22  ;;  %v1144_v25 = vsub.s32 5, %v3973_v23  ;;  %v1152_v12 = vsub.s32 7, %v3973_v23 }
 0x3c8   : > { %v2818_v37 = vmax.f32 %v2802_v28, %v2810_v31  ;;  %v2832_v38 = vmax.f32 %v2804_v30, %v2812_v32  ;;  %v1141_v13 = vrot.slane %v4049_v0, %v1140_v10  ;;  %v1149_v29 = vrot.slane %v4049_v0, %v1148_v11 }
 0x3c9   : > { %v2825_v39 = vmax.f32 %v2803_v33, %v2811_v35  ;;  %v2839_v42 = vmax.f32 %v2805_v34, %v2813_v36  ;;  %v1145_v18 = vrot.slane %v4049_v0, %v1144_v25  ;;  %v1153_v14 = vrot.slane %v4049_v0, %v1152_v12 }
 0x3ca   : > { %v2819_v43 = vrot.slane %v2818_v37, 4  ;;  %v2833_v45 = vrot.slane %v2832_v38, 4 }
 0x3cb   : > { %v2826_v46 = vrot.slane %v2825_v39, 4  ;;  %v2840_v47 = vrot.slane %v2839_v42, 4 }
 0x3cc   : > { %v2820_v40 = vmax.f32 %v2818_v37, %v2819_v43  ;;  %v2834_v41 = vmax.f32 %v2832_v38, %v2833_v45 }
 0x3cd   : > { %v2827_v48 = vmax.f32 %v2825_v39, %v2826_v46  ;;  %v2841_v51 = vmax.f32 %v2839_v42, %v2840_v47 }
 0x3ce   : > { %v2821_v52 = vrot.slane %v2820_v40, 2  ;;  %v2835_v53 = vrot.slane %v2834_v41, 2 }
 0x3cf   : > { %v2828_v54 = vrot.slane %v2827_v48, 2  ;;  %v2842_v55 = vrot.slane %v2841_v51, 2 }
 0x3d0   : > { %v2822_v56 = vmax.f32 %v2820_v40, %v2821_v52  ;;  %v2836_v57 = vmax.f32 %v2834_v41, %v2835_v53 }
 0x3d1   : > { %v2829_v58 = vmax.f32 %v2827_v48, %v2828_v54  ;;  %v2843_v60 = vmax.f32 %v2841_v51, %v2842_v55 }
 0x3d2   : > { %v2823_v61 = vrot.slane %v2822_v56, 1  ;;  %v2837_v62 = vrot.slane %v2836_v57, 1 }
 0x3d3   : > { %v2830_v63 = vrot.slane %v2829_v58, 1  ;;  %v2844_v2 = vrot.slane %v2843_v60, 1 }
 0x3d4   : > { %v2824_v3 = vmax.f32 %v2822_v56, %v2823_v61  ;;  %v2838_v1 = vmax.f32 %v2836_v57, %v2837_v62 }
 0x3d5   : > { %v2831_v26 = vmax.f32 %v2829_v58, %v2830_v63  ;;  %v2845_v19 = vmax.f32 %v2843_v60, %v2844_v2 }
 0x3d7   : > { %v2886_v5 = vcombine.low %v2824_v3, %v2831_v26  ;;  %v2887_v6 = vcombine.low %v2838_v1, %v2845_v19 }
 0x3d9   : > { %v4064_v7 = vrot.slane %v2886_v5, %v4061_v4  ;;  %v4067_v8 = vrot.slane %v2887_v6, %v4061_v4 }
 0x3db   : > { %v2918_v9 = vcombine.low %v4064_v7, %v4067_v8 }
 0x43f   : > { %v2691_v24 = vpop.f32.mrb[8].mxu1 }
 0x440   : > { %v3451_v15 = vadd.f32 %v2691_v24, %v1141_v13  ;;  %v2777_v16 = vpop.f32.mrb[12].mxu0  ;;  %v2693_v17 = vpop.f32.mrb[9].mxu1 }
 0x441   : > { %v3455_v44 = vadd.f32 %v2777_v16, %v1149_v29  ;;  %v3452_v20 = vadd.f32 %v2693_v17, %v1145_v18  ;;  %v2779_v21 = vpop.f32.mrb[13].mxu0  ;;  %v2695_v27 = vpop.f32.mrb[10].mxu1 }
 0x442   : > { %v2790_v22 = vmul.f32 0.01, %v3451_v15  ;;  %v3456_v28 = vadd.f32 %v2779_v21, %v1153_v14  ;;  %v3453_v30 = vadd.f32 %v2695_v27, %v1141_v13  ;;  %v2781_v23 = vpop.f32.mrb[14].mxu0  ;;  %v2697_v31 = vpop.f32.mrb[11].mxu1 }
 0x443   : > { %v2792_v32 = vmul.f32 0.01, %v3455_v44  ;;  %v2791_v33 = vmul.f32 0.01, %v3452_v20  ;;  %v3457_v34 = vadd.f32 %v2781_v23, %v1149_v29  ;;  %v3454_v35 = vadd.f32 %v2697_v31, %v1145_v18  ;;  %v2783_v36 = vpop.f32.mrb[15].mxu0 }
 0x444   : > { %v2793_v37 = vmul.f32 0.01, %v3456_v28  ;;  %v2798_v0 = vmul.f32 0.01, %v3453_v30  ;;  %v3458_v38 = vadd.f32 %v2783_v36, %v1153_v14  ;;  %v2806_v43 = vmax.f32 %v3451_v15, %v2790_v22 }
 0x445   : > { %v2800_v39 = vmul.f32 0.01, %v3457_v34  ;;  %v2799_v42 = vmul.f32 0.01, %v3454_v35  ;;  %v2808_v47 = vmax.f32 %v3455_v44, %v2792_v32  ;;  %v2807_v40 = vmax.f32 %v3452_v20, %v2791_v33 }
 0x446   : > { %v2814_v45 = vmax.f32 %v3453_v30, %v2798_v0  ;;  %v2801_v46 = vmul.f32 0.01, %v3458_v38  ;;  %v2809_v49 = vmax.f32 %v3456_v28, %v2793_v37  ;;  %v2926_v20 = vrot.slane %v2918_v9, %v4061_v4 }
 0x447   : > { %v2816_v41 = vmax.f32 %v3457_v34, %v2800_v39  ;;  %v2815_v48 = vmax.f32 %v3454_v35, %v2799_v42 }
 0x448   : > { %v2846_v50 = vmax.f32 %v2806_v43, %v2814_v45  ;;  %v2817_v51 = vmax.f32 %v3458_v38, %v2801_v46 }
 0x449   : > { %v2860_v52 = vmax.f32 %v2808_v47, %v2816_v41  ;;  %v2853_v53 = vmax.f32 %v2807_v40, %v2815_v48 }
 0x44a   : > { %v2847_v54 = vrot.slane %v2846_v50, 4  ;;  %v2867_v55 = vmax.f32 %v2809_v49, %v2817_v51 }
 0x44b   : > { %v2861_v56 = vrot.slane %v2860_v52, 4  ;;  %v2854_v57 = vrot.slane %v2853_v53, 4 }
 0x44c   : > { %v2848_v58 = vmax.f32 %v2846_v50, %v2847_v54  ;;  %v2868_v59 = vrot.slane %v2867_v55, 4 }
 0x44d   : > { %v2862_v60 = vmax.f32 %v2860_v52, %v2861_v56  ;;  %v2855_v61 = vmax.f32 %v2853_v53, %v2854_v57 }
 0x44e   : > { %v2849_v62 = vrot.slane %v2848_v58, 2  ;;  %v2869_v63 = vmax.f32 %v2867_v55, %v2868_v59 }
 0x44f   : > { %v2863_v2 = vrot.slane %v2862_v60, 2  ;;  %v2856_v3 = vrot.slane %v2855_v61, 2 }
 0x450   : > { %v2850_v1 = vmax.f32 %v2848_v58, %v2849_v62  ;;  %v2870_v26 = vrot.slane %v2869_v63, 2 }
 0x451   : > { %v2864_v19 = vmax.f32 %v2862_v60, %v2863_v2  ;;  %v2857_v5 = vmax.f32 %v2855_v61, %v2856_v3 }
 0x452   : > { %v2851_v6 = vrot.slane %v2850_v1, 1  ;;  %v2871_v10 = vmax.f32 %v2869_v63, %v2870_v26 }
 0x453   : > { %v2865_v11 = vrot.slane %v2864_v19, 1  ;;  %v2858_v25 = vrot.slane %v2857_v5, 1 }
 0x454   : > { %v2852_v12 = vmax.f32 %v2850_v1, %v2851_v6  ;;  %v2872_v13 = vrot.slane %v2871_v10, 1 }
 0x455   : > { %v2866_v29 = vmax.f32 %v2864_v19, %v2865_v11  ;;  %v2859_v18 = vmax.f32 %v2857_v5, %v2858_v25 }
 0x456   : > { %v2873_v14 = vmax.f32 %v2871_v10, %v2872_v13 }
 0x457   : > { %v2888_v24 = vcombine.low %v2852_v12, %v2859_v18 }
 0x458   : > { %v2889_v15 = vcombine.low %v2866_v29, %v2873_v14 }
 0x459   : > { %v2910_v16 = vrot.slane %v2888_v24, %v4061_v4 }
 0x45a   : > { %v2917_v17 = vrot.slane %v2889_v15, %v4061_v4 }
 0x45c   : > { %v2919_v44 = vcombine.low %v2910_v16, %v2917_v17 }
 0x45e   : > { %v2933_v21 = vrot.slane %v2919_v44, %v4061_v4 }
 0x460   : > { %v2934_v27 = vcombine.low %v2926_v20, %v2933_v21 }
 0x462   : > { %2936 = vst [vmem:[%s378_s28] sm:$0xff] %v2934_v27 }
 0x463   : > { %3686 = shalt.err (!%p3683_p6)
}
 0x464   : > { %s3687_s15 = scalar_lea.hbm %s4091_s22, 128  ;;  %s3691_s16 = scalar_lea.hbm %s4147_s9, 512 }
 0x465   : > { %p3688_p7 = scmp.ne.s32.totalorder %s4091_s22, %s3687_s15  ;;  %p3692_p0 = scmp.lt.u32.totalorder %s4091_s22, %s4147_s9 }
 0x466   : > { %p3693_p1 = scmp.lt.u32.totalorder %s3691_s16, %s3687_s15  ;;  %p3695_p13 = scmp.lt.u32.totalorder %s3687_s15, %s4091_s22 }
 0x467   : > { %p3689_p9 = pnand %p3688_p7, %p4168_p8 }
 0x468   : > { %p3694_p4 = por %p3693_p1, %p3692_p0 }
 0x469   : > { %p3690_p12 = pneg %p3689_p9 }
 0x46a   : > { %p3696_p10 = por %p3695_p13, %p3694_p4 }
 0x46c   : > { %p3697_p11 = pnand %p3696_p10, %p3690_p12 }
 0x46e   : > { %3700 = shalt.err (!%p3697_p11)
}
 0x46f   : > { %3483 = dma.vmem_to_hbm [thread:$0]  (%p4168_p8), %s4093_s26, 128, %s4091_s22, %s3003_s12  }
 0x470 PF: > { %s4169_s25 = sld [smem:[#allocation14_spill]]  ;;  %p3500_p2 = scmp.ge.s32.totalorder %s3759_s14, 2 }
 0x471   : > { %s3029_s28 = sand.u32 1, %s3739_s30  }
 0x472   : > { %s3030_s11 = scalar_lea.sflag [#allocation4], %s3029_s28 }
 0x476   : > { %p4170_p3 = scmp.ne.s32.totalorder %s4169_s25, 0 }
 0x478   : > { %p3493_p5 = pnand %p3500_p2, %p4170_p3 }
 0x47a   : > { %3734 = dma.done.wait (!%p3493_p5), %s3030_s11, 128  }
 0x47b   : > { %3736 = vsyncadd (!%p3493_p5), %s3030_s11, 4294967168  ;;  %s24_s14 = sadd.s32 1, %s3759_s14   ;;  %s4171_s21 = sld [smem:[#allocation11_spill]] }
 0x47c   : > { %p21_p6 = scmp.ge.s32.totalorder %s24_s14, 6   ;;  %s4172_s11 = sld [smem:[#allocation15_spill]] }
 0x47d   : > { %s4173_s12 = sld [smem:[#allocation12_spill]]  ;;  %s4174_s13 = sld [smem:[#allocation13_spill]] }
 0x47e   : > { %s4175_s30 = smov %s3743_s10  ;;  %23 = sbr.rel (!%p21_p6) target bundleno = 6 (0x6), region = 108 }
 0x481   : > { %s4176_s10 = smov %s4171_s21 }
 0x485   :  { %3035 = vsyncpa [#allocation3], 1 }
 0x486   :  { %3037 = vsyncpa [#allocation3 + $0x1], 1 }
 0x487   :  { %3038 = vsyncpa [#allocation6], 1 }
 0x488   :  { %3039 = vsyncpa [#allocation4], 1 }
 0x489   :  { %3041 = vsyncpa [#allocation4 + $0x1], 1 }

</bundles_post_ra>
